<compile_context>
chip_gen: v6e
topology: v6e:2x2x1
jax: 0.10.0
libtpu: 0.0.40
codegen_flags: <defaults>
</compile_context>

<pallas_src>
import jax
import jax.numpy as jnp
import numpy as np
from jax import lax
from jax.experimental import pallas as pl
from jax.experimental.pallas import tpu as pltpu

EPS = 1e-5
NEG_SLOPE = 0.1


def _leaky(x):
    # LeakyReLU(0.1) == max(x, 0.1*x) for all x.
    return jnp.maximum(x, NEG_SLOPE * x)


# ----------------------------------------------------------------------------
# shared conv2 (3x3, stride 1, zero padding) helper
# ----------------------------------------------------------------------------
def _conv2_acc(h1p, w2, fuse_k):
    """3x3 conv from conv1 output rows (halo / zero rows already included).

    h1p : (TH+2, W, C2) f32   conv1+BN1+leaky output incl. one halo row per side
    w2  : (9*C2, C) bf16 when fuse_k else (3, 3, C2, C) bf16  ([kx, ky, i, o])
    Returns an f32 (TH*W, C) value-level accumulator (no VMEM scratch traffic).
    """
    thp2, W, C2 = h1p.shape
    TH = thp2 - 2
    col = lax.broadcasted_iota(jnp.int32, (1, W, 1), 1)
    # kx=0 tap reads column w-1 (zero at w==0); kx=2 tap reads w+1 (zero at W-1).
    h1l = jnp.where(col >= 1, pltpu.roll(h1p, 1, axis=1), jnp.zeros_like(h1p))
    h1r = jnp.where(col <= W - 2, pltpu.roll(h1p, W - 1, axis=1),
                    jnp.zeros_like(h1p))
    taps = tuple(t.astype(jnp.bfloat16) for t in (h1l, h1p, h1r))
    M = TH * W
    if fuse_k:
        # C2 % 128 == 0: lane-aligned concat -> one fat matmul with K = 9*C2.
        slab = jnp.concatenate(
            [taps[kx][ky:ky + TH] for kx in range(3) for ky in range(3)],
            axis=-1)
        return jnp.dot(slab.reshape(M, 9 * C2), w2,
                       preferred_element_type=jnp.float32)
    # Small C2: skip the lane concat; 9 matmuls with value-level accumulation.
    acc = None
    for kx in range(3):
        for ky in range(3):
            d = jnp.dot(taps[kx][ky:ky + TH].reshape(M, C2), w2[kx, ky],
                        preferred_element_type=jnp.float32)
            acc = d if acc is None else acc + d
    return acc


# ----------------------------------------------------------------------------
# kernel 1: one repeat, tiled over (batch, H tiles)   [fallback path]
# ----------------------------------------------------------------------------
def _make_tiled_kernel(use_residual, fuse_k):
    """Refs: x_blk (1,TH,W,C) bf16 pipelined | x_hbm (N,H,W,C) bf16 (pl.ANY) |
    w1 (C,C2) bf16 | b1 (1,C2) f32 | w2 bf16 | b2 (1,C) f32 |
    o (1,TH,W,C) bf16 | halo (2,W,C) bf16 VMEM | sem DMA(2)."""

    def kernel(x_blk, x_hbm, w1_ref, b1_ref, w2_ref, b2_ref, o_ref, halo, sem):
        _, TH, W, C = x_blk.shape
        C2 = w1_ref.shape[-1]
        H = x_hbm.shape[1]
        n = pl.program_id(0)
        t = pl.program_id(1)
        nt = pl.num_programs(1)
        h0 = t * TH

        # Kick off the two 1-row halo DMAs; the TH bulk rows arrive through the
        # auto-pipelined x_blk, so only the halo is manual and its latency is
        # hidden behind the interior conv1 below.
        top = jnp.maximum(h0 - 1, 0)
        bot = jnp.minimum(h0 + TH, H - 1)
        cp_top = pltpu.make_async_copy(x_hbm.at[n, pl.ds(top, 1)],
                                       halo.at[pl.ds(0, 1)], sem.at[0])
        cp_bot = pltpu.make_async_copy(x_hbm.at[n, pl.ds(bot, 1)],
                                       halo.at[pl.ds(1, 1)], sem.at[1])
        cp_top.start()
        cp_bot.start()

        # Conv1x1 (BN1 folded) + bias + LeakyReLU on the interior rows.
        xi = x_blk[0].reshape(TH * W, C)
        h1_mid = _leaky(
            jnp.dot(xi, w1_ref[...], preferred_element_type=jnp.float32)
            + b1_ref[...]).reshape(TH, W, C2)

        cp_top.wait()
        cp_bot.wait()
        hh = _leaky(
            jnp.dot(halo[...].reshape(2 * W, C), w1_ref[...],
                    preferred_element_type=jnp.float32)
            + b1_ref[...]).reshape(2, W, C2)
        # Only the two halo rows can fall outside the image (zero padding).
        h1_top = jnp.where(t > 0, hh[0:1], jnp.zeros_like(hh[0:1]))
        h1_bot = jnp.where(t < nt - 1, hh[1:2], jnp.zeros_like(hh[1:2]))
        h1p = jnp.concatenate([h1_top, h1_mid, h1_bot], axis=0)  # (TH+2,W,C2)

        acc = _conv2_acc(h1p, w2_ref[...], fuse_k)               # f32 (TH*W,C)
        y = _leaky(acc + b2_ref[...])
        if use_residual:
            y = y + xi.astype(jnp.float32)
        o_ref[...] = y.reshape(o_ref.shape).astype(o_ref.dtype)

    return kernel


# ----------------------------------------------------------------------------
# kernel 2: all repeats fused, activation VMEM-resident   [preferred path]
# ----------------------------------------------------------------------------
def _make_fused_repeats_kernel(use_residual, fuse_k):
    """grid = (batch, repeat); repeat axis is 'arbitrary'.  x/out block indices
    are constant across repeats, so x is DMA'd once per image, the output block
    stays VMEM-resident and flushes to HBM once per image."""

    def kernel(x_ref, w1_ref, b1_ref, w2_ref, b2_ref, o_ref, act_ref):
        _, H, W, C = x_ref.shape
        C2 = w1_ref.shape[-1]
        r = pl.program_id(1)

        @pl.when(r == 0)
        def _():
            act_ref[...] = x_ref[0]

        xb = act_ref[...]                                    # (H, W, C) bf16
        M = H * W
        h1 = _leaky(
            jnp.dot(xb.reshape(M, C), w1_ref[0],
                    preferred_element_type=jnp.float32) + b1_ref[0]
        ).reshape(H, W, C2)
        zrow = jnp.zeros((1, W, C2), h1.dtype)
        h1p = jnp.concatenate([zrow, h1, zrow], axis=0)      # zero pad rows
        acc = _conv2_acc(h1p, w2_ref[0], fuse_k)
        y = _leaky(acc + b2_ref[0])
        if use_residual:
            y = y + xb.reshape(M, C).astype(jnp.float32)
        yb = y.reshape(H, W, C).astype(jnp.bfloat16)
        act_ref[...] = yb
        o_ref[0] = yb

    return kernel


# ----------------------------------------------------------------------------
# VMEM budgeting (per-generation) and tile selection
# ----------------------------------------------------------------------------
def _vmem_capacity_bytes():
    try:
        cap = int(getattr(pltpu.get_tpu_info(), "vmem_capacity_bytes", 0))
        if cap > 0:
            return cap
    except Exception:
        pass
    return 128 * 1024 * 1024


def _per_row_bytes(W, C, C2, fuse_k):
    return W * (
        4 * C * 2                              # double-buffered in + out (bf16)
        + 3 * C2 * 4 + 3 * C2 * 2              # f32 h1 taps + bf16 copies
        + (9 * C2 * 2 if fuse_k else 0)        # fused-K slab
        + 2 * C * 4)                           # f32 accumulator + epilogue


def _weight_bytes(C, C2):
    return 2 * (C * C2 + 9 * C2 * C) * 2       # double-buffered folded weights


def _pick_tile_h(H, W, C, C2, fuse_k, budget_bytes, tile_h=None):
    if tile_h is not None:
        assert H % tile_h == 0, "tile_h must divide H"
        return int(tile_h)
    bpr = _per_row_bytes(W, C, C2, fuse_k)
    fixed = _weight_bytes(C, C2) + 4 * W * C * 2
    avail = max(budget_bytes - fixed, bpr)
    th = max(1, min(H, avail // bpr))
    while H % th:
        th -= 1
    return int(th)


def _fused_repeats_fits(H, W, C, C2, fuse_k, budget_bytes):
    est = (H * _per_row_bytes(W, C, C2, fuse_k)    # blocks + intermediates
           + H * W * C * 2                         # resident activation scratch
           + _weight_bytes(C, C2))
    return est <= budget_bytes


def _const_map(ndim):
    return lambda *idx: (0,) * ndim


def _rep_map(ndim):
    return lambda n, r: (r,) + (0,) * (ndim - 1)


# ----------------------------------------------------------------------------
# wrappers
# ----------------------------------------------------------------------------
def _run_tiled(x, folded, use_residual, fuse_k, tile_h, budget, vmem_limit):
    N, H, W, C = x.shape
    C2 = folded[0]["w1"].shape[-1]
    TH = _pick_tile_h(H, W, C, C2, fuse_k, budget, tile_h)
    nt = H // TH
    w1, b1, w2, b2 = (folded[0][k] for k in ("w1", "b1", "w2", "b2"))

    grid_spec = pltpu.PrefetchScalarGridSpec(
        num_scalar_prefetch=0,
        grid=(N, nt),
        in_specs=[
            pl.BlockSpec((1, TH, W, C), lambda n, t: (n, t, 0, 0)),  # pipelined
            pl.BlockSpec(memory_space=pl.ANY),                       # halo src
            pl.BlockSpec(w1.shape, _const_map(w1.ndim)),             # resident
            pl.BlockSpec(b1.shape, _const_map(b1.ndim)),
            pl.BlockSpec(w2.shape, _const_map(w2.ndim)),
            pl.BlockSpec(b2.shape, _const_map(b2.ndim)),
        ],
        out_specs=pl.BlockSpec((1, TH, W, C), lambda n, t: (n, t, 0, 0)),
        scratch_shapes=[
            pltpu.VMEM((2, W, C), jnp.bfloat16),     # halo rows
            pltpu.SemaphoreType.DMA((2,)),
        ],
    )
    call = pl.pallas_call(
        _make_tiled_kernel(use_residual, fuse_k),
        out_shape=jax.ShapeDtypeStruct((N, H, W, C), jnp.bfloat16),
        grid_spec=grid_spec,
        compiler_params=pltpu.CompilerParams(
            dimension_semantics=("parallel", "parallel"),
            vmem_limit_bytes=vmem_limit,
        ),
    )
    # TODO(synk): this fallback still round-trips HBM once per repeat; the
    # fused-repeats path keeps activations VMEM-resident when they fit.
    for p in folded:
        x = call(x, x, p["w1"], p["b1"], p["w2"], p["b2"])
    return x


def _run_fused_repeats(x, folded, use_residual, fuse_k, vmem_limit):
    N, H, W, C = x.shape
    R = len(folded)
    w1s = jnp.stack([p["w1"] for p in folded])       # (R, C, C2)
    b1s = jnp.stack([p["b1"] for p in folded])       # (R, 1, C2)
    w2s = jnp.stack([p["w2"] for p in folded])       # (R, ...) bf16
    b2s = jnp.stack([p["b2"] for p in folded])       # (R, 1, C)

    grid_spec = pltpu.PrefetchScalarGridSpec(
        num_scalar_prefetch=0,
        grid=(N, R),
        in_specs=[
            pl.BlockSpec((1, H, W, C), lambda n, r: (n, 0, 0, 0)),
            pl.BlockSpec((1,) + w1s.shape[1:], _rep_map(w1s.ndim)),
            pl.BlockSpec((1,) + b1s.shape[1:], _rep_map(b1s.ndim)),
            pl.BlockSpec((1,) + w2s.shape[1:], _rep_map(w2s.ndim)),
            pl.BlockSpec((1,) + b2s.shape[1:], _rep_map(b2s.ndim)),
        ],
        out_specs=pl.BlockSpec((1, H, W, C), lambda n, r: (n, 0, 0, 0)),
        scratch_shapes=[pltpu.VMEM((H, W, C), jnp.bfloat16)],
    )
    return pl.pallas_call(
        _make_fused_repeats_kernel(use_residual, fuse_k),
        out_shape=jax.ShapeDtypeStruct((N, H, W, C), jnp.bfloat16),
        grid_spec=grid_spec,
        compiler_params=pltpu.CompilerParams(
            dimension_semantics=("parallel", "arbitrary"),
            vmem_limit_bytes=vmem_limit,
        ),
    )(x, w1s, b1s, w2s, b2s)


def _fold_params(p, fuse_k):
    """Fold eval-mode BN into the conv weights / a per-channel f32 bias and
    pack the 3x3 taps for the kernel ([kx, ky, i, o] or flattened 9*C2 x C)."""
    C2, C = p["w1_t"].shape[0], p["w1_t"].shape[1]
    s1 = p["g1"] / jnp.sqrt(p["rv1"] + EPS)
    s2 = p["g2"] / jnp.sqrt(p["rv2"] + EPS)
    bias1 = (p["b1"] - p["rm1"]) * s1 + p["beta1"]
    bias2 = (p["b2"] - p["rm2"]) * s2 + p["beta2"]
    w1 = jnp.transpose(p["w1_t"][:, :, 0, 0], (1, 0)) * s1[None, :]   # (C, C2)
    taps = jnp.stack([
        jnp.stack([jnp.transpose(p["w2_t"][:, :, ky, kx], (1, 0)) * s2[None, :]
                   for ky in range(3)])
        for kx in range(3)])                                          # (3,3,C2,C)
    w2 = taps.reshape(9 * C2, C) if fuse_k else taps
    return dict(w1=w1.astype(jnp.bfloat16),
                b1=bias1.reshape(1, C2).astype(jnp.float32),
                w2=w2.astype(jnp.bfloat16),
                b2=bias2.reshape(1, C).astype(jnp.float32))


def residual_block_forward(x_nchw, params, use_residual=True, tile_h=None,
                           fuse_repeats=None):
    """Pallas implementation of ResidualBlock.forward (NCHW f32 in/out)."""
    x = jnp.transpose(x_nchw, (0, 2, 3, 1)).astype(jnp.bfloat16)   # NHWC bf16
    N, H, W, C = x.shape
    assert C % 2 == 0
    C2 = C // 2
    fuse_k = (C2 % 128 == 0)     # single K=9*C2 matmul only when lane-aligned
    folded = [_fold_params(p, fuse_k) for p in params]

    cap = _vmem_capacity_bytes()                 # 64 MiB/TC on v7x, 128 on v5e/v6e
    budget = int(cap * 0.40)
    vmem_limit = min(int(cap * 0.75), 100 * 1024 * 1024)

    if fuse_repeats is None:
        fuse_repeats = (tile_h is None
                        and _fused_repeats_fits(H, W, C, C2, fuse_k, budget))
    if fuse_repeats:
        out = _run_fused_repeats(x, folded, use_residual, fuse_k, vmem_limit)
    else:
        out = _run_tiled(x, folded, use_residual, fuse_k, tile_h, budget,
                         vmem_limit)
    return jnp.transpose(out.astype(jnp.float32), (0, 3, 1, 2))      # NCHW f32


# ----------------------------------------------------------------------------
# deterministic parameter init (PyTorch shapes) + pure-JAX reference
# ----------------------------------------------------------------------------
def init_params(key, channels, num_repeats):
    C, C2 = channels, channels // 2
    sc1 = 1.0 / np.sqrt(C)
    sc2 = 1.0 / np.sqrt(9 * C2)
    params = []
    for _ in range(num_repeats):
        key, sub = jax.random.split(key)
        ks = jax.random.split(sub, 12)
        params.append(dict(
            w1_t=jax.random.normal(ks[0], (C2, C, 1, 1), jnp.float32) * sc1,
            b1=jax.random.normal(ks[1], (C2,), jnp.float32) * 0.1,
            g1=1.0 + 0.1 * jax.random.normal(ks[2], (C2,), jnp.float32),
            beta1=0.1 * jax.random.normal(ks[3], (C2,), jnp.float32),
            rm1=0.1 * jax.random.normal(ks[4], (C2,), jnp.float32),
            rv1=jnp.abs(jax.random.normal(ks[5], (C2,), jnp.float32)) + 0.5,
            w2_t=jax.random.normal(ks[6], (C, C2, 3, 3), jnp.float32) * sc2,
            b2=jax.random.normal(ks[7], (C,), jnp.float32) * 0.1,
            g2=1.0 + 0.1 * jax.random.normal(ks[8], (C,), jnp.float32),
            beta2=0.1 * jax.random.normal(ks[9], (C,), jnp.float32),
            rm2=0.1 * jax.random.normal(ks[10], (C,), jnp.float32),
            rv2=jnp.abs(jax.random.normal(ks[11], (C,), jnp.float32)) + 0.5,
        ))
    return params


def _bn(y, g, beta, rm, rv):
    c = lambda v: v[None, :, None, None]
    return (y - c(rm)) / jnp.sqrt(c(rv) + EPS) * c(g) + c(beta)


def ref_forward(x, params, use_residual=True):
    """Pure-JAX f32 reference (NCHW, lax.conv) mirroring the PyTorch module."""
    dn = ("NCHW", "OIHW", "NCHW")
    for p in params:
        res = x
        y = lax.conv_general_dilated(x, p["w1_t"], (1, 1), "VALID",
                                     dimension_numbers=dn)
        y = y + p["b1"][None, :, None, None]
        y = _leaky(_bn(y, p["g1"], p["beta1"], p["rm1"], p["rv1"]))
        y = lax.conv_general_dilated(y, p["w2_t"], (1, 1),
                                     ((1, 1), (1, 1)), dimension_numbers=dn)
        y = y + p["b2"][None, :, None, None]
        y = _leaky(_bn(y, p["g2"], p["beta2"], p["rm2"], p["rv2"]))
        x = y + res if use_residual else y
    return x


if __name__ == "__main__":
    key = jax.random.PRNGKey(0)

    # Case 1: small channels (C2 % 128 != 0 -> 9-matmul conv2 path); the auto
    # path fuses both repeats in one pallas_call with VMEM-resident activations.
    channels, num_repeats = 4, 2
    N, H, W = 2, 16, 16
    key, xk, pk = jax.random.split(key, 3)
    x = jax.random.normal(xk, (N, channels, H, W), jnp.float32)     # NCHW
    params = init_params(pk, channels, num_repeats)
    ref = ref_forward(x, params, use_residual=True)

    out_fused = jax.block_until_ready(
        residual_block_forward(x, params, use_residual=True))
    np.testing.assert_allclose(np.asarray(out_fused), np.asarray(ref),
                               rtol=5e-2, atol=5e-2)

    # Case 2: same problem forced through the tiled per-repeat kernel
    # (exercises halo DMAs, border zeroing and pipelined input blocks).
    out_tiled = jax.block_until_ready(
        residual_block_forward(x, params, use_residual=True,
                               fuse_repeats=False, tile_h=8))
    np.testing.assert_allclose(np.asarray(out_tiled), np.asarray(ref),
                               rtol=5e-2, atol=5e-2)

    # Case 3: lane-aligned channels (C2 = 128 -> single fused K = 9*C2 matmul).
    channels2, num_repeats2 = 256, 1
    N2, H2, W2 = 1, 8, 8
    key, xk2, pk2 = jax.random.split(key, 3)
    x2 = jax.random.normal(xk2, (N2, channels2, H2, W2), jnp.float32)
    params2 = init_params(pk2, channels2, num_repeats2)
    ref2 = ref_forward(x2, params2, use_residual=True)
    out2 = jax.block_until_ready(
        residual_block_forward(x2, params2, use_residual=True))
    np.testing.assert_allclose(np.asarray(out2), np.asarray(ref2),
                               rtol=5e-2, atol=5e-2)

    print("KERNEL_OK")
</pallas_src>

<mosaic_0001>
module attributes {stable_mosaic.version = 11 : i64} {
  func.func @kernel(%arg0: i32, %arg1: i32, %arg2: memref<1x16x16x4xbf16, #tpu.memory_space<vmem>>, %arg3: memref<1x4x2xbf16, #tpu.memory_space<vmem>>, %arg4: memref<1x1x2xf32, #tpu.memory_space<vmem>>, %arg5: memref<1x3x3x2x4xbf16, #tpu.memory_space<vmem>>, %arg6: memref<1x1x4xf32, #tpu.memory_space<vmem>>, %arg7: memref<1x16x16x4xbf16, #tpu.memory_space<vmem>>, %arg8: memref<16x16x4xbf16, #tpu.memory_space<vmem>>) attributes {dimension_semantics = [#tpu.dimension_semantics<parallel>, #tpu.dimension_semantics<arbitrary>], iteration_bounds = array<i64: 2, 2>, scalar_prefetch = 0 : i64, scratch_operands = 1 : i64, tpu.core_type = #tpu.core_type<tc>, window_params = [{transform_indices = @transform_0, window_bounds = array<i64: 1, 16, 16, 4>}, {transform_indices = @transform_1, window_bounds = array<i64: 1, 4, 2>}, {transform_indices = @transform_2, window_bounds = array<i64: 1, 1, 2>}, {transform_indices = @transform_3, window_bounds = array<i64: 1, 3, 3, 2, 4>}, {transform_indices = @transform_4, window_bounds = array<i64: 1, 1, 4>}, {transform_indices = @transform_5, window_bounds = array<i64: 1, 16, 16, 4>}]} {
    %c0_i32 = arith.constant 0 : i32
    %0 = arith.cmpi eq, %arg1, %c0_i32 : i32
    %1 = arith.extui %0 : i1 to i32
    %c0_i32_0 = arith.constant 0 : i32
    %2 = arith.cmpi ne, %1, %c0_i32_0 : i32
    scf.if %2 {
      %c0_39 = arith.constant 0 : index
      %c0_40 = arith.constant 0 : index
      %c0_41 = arith.constant 0 : index
      %c0_42 = arith.constant 0 : index
      %107 = vector.load %arg2[%c0_39, %c0_40, %c0_41, %c0_42] : memref<1x16x16x4xbf16, #tpu.memory_space<vmem>>, vector<1x16x16x4xbf16>
      %108 = vector.shape_cast %107 : vector<1x16x16x4xbf16> to vector<16x16x4xbf16>
      %c0_43 = arith.constant 0 : index
      %c0_44 = arith.constant 0 : index
      %c0_45 = arith.constant 0 : index
      %109 = vector.load %arg8[%c0_43, %c0_44, %c0_45] : memref<16x16x4xbf16, #tpu.memory_space<vmem>>, vector<16x16x4xbf16>
      tpu.vector_store %arg8[%c0_43, %c0_44, %c0_45], %108 {strides = array<i32>} : memref<16x16x4xbf16, #tpu.memory_space<vmem>>, vector<16x16x4xbf16>,
    } else {
    }
    %c0 = arith.constant 0 : index
    %c0_1 = arith.constant 0 : index
    %c0_2 = arith.constant 0 : index
    %3 = vector.load %arg8[%c0, %c0_1, %c0_2] : memref<16x16x4xbf16, #tpu.memory_space<vmem>>, vector<16x16x4xbf16>
    %4 = vector.shape_cast %3 : vector<16x16x4xbf16> to vector<256x4xbf16>
    %c0_3 = arith.constant 0 : index
    %c0_4 = arith.constant 0 : index
    %c0_5 = arith.constant 0 : index
    %5 = vector.load %arg3[%c0_3, %c0_4, %c0_5] : memref<1x4x2xbf16, #tpu.memory_space<vmem>>, vector<1x4x2xbf16>
    %6 = vector.shape_cast %5 : vector<1x4x2xbf16> to vector<4x2xbf16>
    %cst = arith.constant dense<0.000000e+00> : vector<256x2xf32>
    %7 = tpu.matmul %4, %6, %cst {dimension_numbers = #tpu.dot_dimension_numbers<[1], [0], [0], [1], [0, 0, 1, 1], [], []>} : vector<256x4xbf16>, vector<4x2xbf16>, vector<256x2xf32> -> vector<256x2xf32>
    %c0_6 = arith.constant 0 : index
    %c0_7 = arith.constant 0 : index
    %c0_8 = arith.constant 0 : index
    %8 = vector.load %arg4[%c0_6, %c0_7, %c0_8] : memref<1x1x2xf32, #tpu.memory_space<vmem>>, vector<1x1x2xf32>
    %9 = vector.shape_cast %8 : vector<1x1x2xf32> to vector<1x2xf32>
    %10 = vector.broadcast %9 : vector<1x2xf32> to vector<256x2xf32>
    %11 = arith.addf %7, %10 : vector<256x2xf32>
    %cst_9 = arith.constant 1.000000e-01 : f32
    %12 = vector.broadcast %cst_9 : f32 to vector<256x2xf32>
    %13 = arith.mulf %12, %11 : vector<256x2xf32>
    %14 = arith.maximumf %11, %13 : vector<256x2xf32>
    %15 = vector.shape_cast %14 : vector<256x2xf32> to vector<16x16x2xf32>
    %cst_10 = arith.constant 0.000000e+00 : f32
    %16 = vector.broadcast %cst_10 : f32 to vector<1x16x2xf32>
    %17 = tpu.concatenate %16, %15, %16 in 0 : vector<1x16x2xf32>, vector<16x16x2xf32>, vector<1x16x2xf32> -> vector<18x16x2xf32>
    %c0_11 = arith.constant 0 : index
    %c0_12 = arith.constant 0 : index
    %c0_13 = arith.constant 0 : index
    %c0_14 = arith.constant 0 : index
    %c0_15 = arith.constant 0 : index
    %18 = vector.load %arg5[%c0_11, %c0_12, %c0_13, %c0_14, %c0_15] : memref<1x3x3x2x4xbf16, #tpu.memory_space<vmem>>, vector<1x3x3x2x4xbf16>
    %19 = vector.shape_cast %18 : vector<1x3x3x2x4xbf16> to vector<3x3x2x4xbf16>
    %20 = tpu.iota {dimensions = array<i32: 1>} : vector<1x16x1xi32>
    %c1_i32 = arith.constant 1 : i32
    %21 = vector.broadcast %c1_i32 : i32 to vector<1x16x1xi32>
    %22 = arith.cmpi sge, %20, %21 : vector<1x16x1xi32>
    %c1_i32_16 = arith.constant 1 : i32
    %23 = tpu.dynamic_rotate %17 by %c1_i32_16 dim 1 : vector<18x16x2xf32>, i32 -> vector<18x16x2xf32>
    %cst_17 = arith.constant 0.000000e+00 : f32
    %24 = vector.broadcast %cst_17 : f32 to vector<18x16x2xf32>
    %25 = vector.shape_cast %22 : vector<1x16x1xi1> to vector<1x16x1xi1>
    %26 = vector.broadcast %25 : vector<1x16x1xi1> to vector<18x16x2xi1>
    %27 = arith.select %26, %23, %24 : vector<18x16x2xi1>, vector<18x16x2xf32>
    %c14_i32 = arith.constant 14 : i32
    %28 = vector.broadcast %c14_i32 : i32 to vector<1x16x1xi32>
    %29 = arith.cmpi sle, %20, %28 : vector<1x16x1xi32>
    %c15_i32 = arith.constant 15 : i32
    %30 = tpu.dynamic_rotate %17 by %c15_i32 dim 1 : vector<18x16x2xf32>, i32 -> vector<18x16x2xf32>
    %cst_18 = arith.constant 0.000000e+00 : f32
    %31 = vector.broadcast %cst_18 : f32 to vector<18x16x2xf32>
    %32 = vector.shape_cast %29 : vector<1x16x1xi1> to vector<1x16x1xi1>
    %33 = vector.broadcast %32 : vector<1x16x1xi1> to vector<18x16x2xi1>
    %34 = arith.select %33, %30, %31 : vector<18x16x2xi1>, vector<18x16x2xf32>
    %35 = arith.truncf %27 : vector<18x16x2xf32> to vector<18x16x2xbf16>
    %36 = arith.truncf %17 : vector<18x16x2xf32> to vector<18x16x2xbf16>
    %37 = arith.truncf %34 : vector<18x16x2xf32> to vector<18x16x2xbf16>
    %38 = vector.extract_strided_slice %35 {offsets = [0, 0, 0], sizes = [16, 16, 2], strides = [1, 1, 1]} : vector<18x16x2xbf16> to vector<16x16x2xbf16>
    %39 = vector.shape_cast %38 : vector<16x16x2xbf16> to vector<256x2xbf16>
    %40 = vector.extract_strided_slice %19 {offsets = [0, 0, 0, 0], sizes = [1, 1, 2, 4], strides = [1, 1, 1, 1]} : vector<3x3x2x4xbf16> to vector<1x1x2x4xbf16>
    %41 = vector.shape_cast %40 : vector<1x1x2x4xbf16> to vector<2x4xbf16>
    %cst_19 = arith.constant dense<0.000000e+00> : vector<256x4xf32>
    %42 = tpu.matmul %39, %41, %cst_19 {dimension_numbers = #tpu.dot_dimension_numbers<[1], [0], [0], [1], [0, 0, 1, 1], [], []>} : vector<256x2xbf16>, vector<2x4xbf16>, vector<256x4xf32> -> vector<256x4xf32>
    %43 = vector.extract_strided_slice %35 {offsets = [1, 0, 0], sizes = [16, 16, 2], strides = [1, 1, 1]} : vector<18x16x2xbf16> to vector<16x16x2xbf16>
    %44 = vector.shape_cast %43 : vector<16x16x2xbf16> to vector<256x2xbf16>
    %45 = vector.extract_strided_slice %19 {offsets = [0, 1, 0, 0], sizes = [1, 1, 2, 4], strides = [1, 1, 1, 1]} : vector<3x3x2x4xbf16> to vector<1x1x2x4xbf16>
    %46 = vector.shape_cast %45 : vector<1x1x2x4xbf16> to vector<2x4xbf16>
    %cst_20 = arith.constant dense<0.000000e+00> : vector<256x4xf32>
    %47 = tpu.matmul %44, %46, %cst_20 {dimension_numbers = #tpu.dot_dimension_numbers<[1], [0], [0], [1], [0, 0, 1, 1], [], []>} : vector<256x2xbf16>, vector<2x4xbf16>, vector<256x4xf32> -> vector<256x4xf32>
    %48 = arith.addf %42, %47 : vector<256x4xf32>
    %49 = vector.extract_strided_slice %35 {offsets = [2, 0, 0], sizes = [16, 16, 2], strides = [1, 1, 1]} : vector<18x16x2xbf16> to vector<16x16x2xbf16>
    %50 = vector.shape_cast %49 : vector<16x16x2xbf16> to vector<256x2xbf16>
    %51 = vector.extract_strided_slice %19 {offsets = [0, 2, 0, 0], sizes = [1, 1, 2, 4], strides = [1, 1, 1, 1]} : vector<3x3x2x4xbf16> to vector<1x1x2x4xbf16>
    %52 = vector.shape_cast %51 : vector<1x1x2x4xbf16> to vector<2x4xbf16>
    %cst_21 = arith.constant dense<0.000000e+00> : vector<256x4xf32>
    %53 = tpu.matmul %50, %52, %cst_21 {dimension_numbers = #tpu.dot_dimension_numbers<[1], [0], [0], [1], [0, 0, 1, 1], [], []>} : vector<256x2xbf16>, vector<2x4xbf16>, vector<256x4xf32> -> vector<256x4xf32>
    %54 = arith.addf %48, %53 : vector<256x4xf32>
    %55 = vector.extract_strided_slice %36 {offsets = [0, 0, 0], sizes = [16, 16, 2], strides = [1, 1, 1]} : vector<18x16x2xbf16> to vector<16x16x2xbf16>
    %56 = vector.shape_cast %55 : vector<16x16x2xbf16> to vector<256x2xbf16>
    %57 = vector.extract_strided_slice %19 {offsets = [1, 0, 0, 0], sizes = [1, 1, 2, 4], strides = [1, 1, 1, 1]} : vector<3x3x2x4xbf16> to vector<1x1x2x4xbf16>
    %58 = vector.shape_cast %57 : vector<1x1x2x4xbf16> to vector<2x4xbf16>
    %cst_22 = arith.constant dense<0.000000e+00> : vector<256x4xf32>
    %59 = tpu.matmul %56, %58, %cst_22 {dimension_numbers = #tpu.dot_dimension_numbers<[1], [0], [0], [1], [0, 0, 1, 1], [], []>} : vector<256x2xbf16>, vector<2x4xbf16>, vector<256x4xf32> -> vector<256x4xf32>
    %60 = arith.addf %54, %59 : vector<256x4xf32>
    %61 = vector.extract_strided_slice %36 {offsets = [1, 0, 0], sizes = [16, 16, 2], strides = [1, 1, 1]} : vector<18x16x2xbf16> to vector<16x16x2xbf16>
    %62 = vector.shape_cast %61 : vector<16x16x2xbf16> to vector<256x2xbf16>
    %63 = vector.extract_strided_slice %19 {offsets = [1, 1, 0, 0], sizes = [1, 1, 2, 4], strides = [1, 1, 1, 1]} : vector<3x3x2x4xbf16> to vector<1x1x2x4xbf16>
    %64 = vector.shape_cast %63 : vector<1x1x2x4xbf16> to vector<2x4xbf16>
    %cst_23 = arith.constant dense<0.000000e+00> : vector<256x4xf32>
    %65 = tpu.matmul %62, %64, %cst_23 {dimension_numbers = #tpu.dot_dimension_numbers<[1], [0], [0], [1], [0, 0, 1, 1], [], []>} : vector<256x2xbf16>, vector<2x4xbf16>, vector<256x4xf32> -> vector<256x4xf32>
    %66 = arith.addf %60, %65 : vector<256x4xf32>
    %67 = vector.extract_strided_slice %36 {offsets = [2, 0, 0], sizes = [16, 16, 2], strides = [1, 1, 1]} : vector<18x16x2xbf16> to vector<16x16x2xbf16>
    %68 = vector.shape_cast %67 : vector<16x16x2xbf16> to vector<256x2xbf16>
    %69 = vector.extract_strided_slice %19 {offsets = [1, 2, 0, 0], sizes = [1, 1, 2, 4], strides = [1, 1, 1, 1]} : vector<3x3x2x4xbf16> to vector<1x1x2x4xbf16>
    %70 = vector.shape_cast %69 : vector<1x1x2x4xbf16> to vector<2x4xbf16>
    %cst_24 = arith.constant dense<0.000000e+00> : vector<256x4xf32>
    %71 = tpu.matmul %68, %70, %cst_24 {dimension_numbers = #tpu.dot_dimension_numbers<[1], [0], [0], [1], [0, 0, 1, 1], [], []>} : vector<256x2xbf16>, vector<2x4xbf16>, vector<256x4xf32> -> vector<256x4xf32>
    %72 = arith.addf %66, %71 : vector<256x4xf32>
    %73 = vector.extract_strided_slice %37 {offsets = [0, 0, 0], sizes = [16, 16, 2], strides = [1, 1, 1]} : vector<18x16x2xbf16> to vector<16x16x2xbf16>
    %74 = vector.shape_cast %73 : vector<16x16x2xbf16> to vector<256x2xbf16>
    %75 = vector.extract_strided_slice %19 {offsets = [2, 0, 0, 0], sizes = [1, 1, 2, 4], strides = [1, 1, 1, 1]} : vector<3x3x2x4xbf16> to vector<1x1x2x4xbf16>
    %76 = vector.shape_cast %75 : vector<1x1x2x4xbf16> to vector<2x4xbf16>
    %cst_25 = arith.constant dense<0.000000e+00> : vector<256x4xf32>
    %77 = tpu.matmul %74, %76, %cst_25 {dimension_numbers = #tpu.dot_dimension_numbers<[1], [0], [0], [1], [0, 0, 1, 1], [], []>} : vector<256x2xbf16>, vector<2x4xbf16>, vector<256x4xf32> -> vector<256x4xf32>
    %78 = arith.addf %72, %77 : vector<256x4xf32>
    %79 = vector.extract_strided_slice %37 {offsets = [1, 0, 0], sizes = [16, 16, 2], strides = [1, 1, 1]} : vector<18x16x2xbf16> to vector<16x16x2xbf16>
    %80 = vector.shape_cast %79 : vector<16x16x2xbf16> to vector<256x2xbf16>
    %81 = vector.extract_strided_slice %19 {offsets = [2, 1, 0, 0], sizes = [1, 1, 2, 4], strides = [1, 1, 1, 1]} : vector<3x3x2x4xbf16> to vector<1x1x2x4xbf16>
    %82 = vector.shape_cast %81 : vector<1x1x2x4xbf16> to vector<2x4xbf16>
    %cst_26 = arith.constant dense<0.000000e+00> : vector<256x4xf32>
    %83 = tpu.matmul %80, %82, %cst_26 {dimension_numbers = #tpu.dot_dimension_numbers<[1], [0], [0], [1], [0, 0, 1, 1], [], []>} : vector<256x2xbf16>, vector<2x4xbf16>, vector<256x4xf32> -> vector<256x4xf32>
    %84 = arith.addf %78, %83 : vector<256x4xf32>
    %85 = vector.extract_strided_slice %37 {offsets = [2, 0, 0], sizes = [16, 16, 2], strides = [1, 1, 1]} : vector<18x16x2xbf16> to vector<16x16x2xbf16>
    %86 = vector.shape_cast %85 : vector<16x16x2xbf16> to vector<256x2xbf16>
    %87 = vector.extract_strided_slice %19 {offsets = [2, 2, 0, 0], sizes = [1, 1, 2, 4], strides = [1, 1, 1, 1]} : vector<3x3x2x4xbf16> to vector<1x1x2x4xbf16>
    %88 = vector.shape_cast %87 : vector<1x1x2x4xbf16> to vector<2x4xbf16>
    %cst_27 = arith.constant dense<0.000000e+00> : vector<256x4xf32>
    %89 = tpu.matmul %86, %88, %cst_27 {dimension_numbers = #tpu.dot_dimension_numbers<[1], [0], [0], [1], [0, 0, 1, 1], [], []>} : vector<256x2xbf16>, vector<2x4xbf16>, vector<256x4xf32> -> vector<256x4xf32>
    %90 = arith.addf %84, %89 : vector<256x4xf32>
    %c0_28 = arith.constant 0 : index
    %c0_29 = arith.constant 0 : index
    %c0_30 = arith.constant 0 : index
    %91 = vector.load %arg6[%c0_28, %c0_29, %c0_30] : memref<1x1x4xf32, #tpu.memory_space<vmem>>, vector<1x1x4xf32>
    %92 = vector.shape_cast %91 : vector<1x1x4xf32> to vector<1x4xf32>
    %93 = vector.broadcast %92 : vector<1x4xf32> to vector<256x4xf32>
    %94 = arith.addf %90, %93 : vector<256x4xf32>
    %cst_31 = arith.constant 1.000000e-01 : f32
    %95 = vector.broadcast %cst_31 : f32 to vector<256x4xf32>
    %96 = arith.mulf %95, %94 : vector<256x4xf32>
    %97 = arith.maximumf %94, %96 : vector<256x4xf32>
    %98 = vector.shape_cast %3 : vector<16x16x4xbf16> to vector<256x4xbf16>
    %99 = arith.extf %98 : vector<256x4xbf16> to vector<256x4xf32>
    %100 = arith.addf %97, %99 : vector<256x4xf32>
    %101 = vector.shape_cast %100 : vector<256x4xf32> to vector<16x16x4xf32>
    %102 = arith.truncf %101 : vector<16x16x4xf32> to vector<16x16x4xbf16>
    %c0_32 = arith.constant 0 : index
    %c0_33 = arith.constant 0 : index
    %c0_34 = arith.constant 0 : index
    %103 = vector.load %arg8[%c0_32, %c0_33, %c0_34] : memref<16x16x4xbf16, #tpu.memory_space<vmem>>, vector<16x16x4xbf16>
    tpu.vector_store %arg8[%c0_32, %c0_33, %c0_34], %102 {strides = array<i32>} : memref<16x16x4xbf16, #tpu.memory_space<vmem>>, vector<16x16x4xbf16>,
    %c0_35 = arith.constant 0 : index
    %c0_36 = arith.constant 0 : index
    %c0_37 = arith.constant 0 : index
    %c0_38 = arith.constant 0 : index
    %104 = vector.load %arg7[%c0_35, %c0_36, %c0_37, %c0_38] : memref<1x16x16x4xbf16, #tpu.memory_space<vmem>>, vector<1x16x16x4xbf16>
    %105 = vector.shape_cast %104 : vector<1x16x16x4xbf16> to vector<16x16x4xbf16>
    %106 = vector.shape_cast %102 : vector<16x16x4xbf16> to vector<1x16x16x4xbf16>
    tpu.vector_store %arg7[%c0_35, %c0_36, %c0_37, %c0_38], %106 {strides = array<i32>} : memref<1x16x16x4xbf16, #tpu.memory_space<vmem>>, vector<1x16x16x4xbf16>,
    return
  }
  func.func @transform_0(%arg0: i32, %arg1: i32) -> (i32, i32, i32, i32) {
    %c0_i32 = arith.constant 0 : i32
    %c0_i32_0 = arith.constant 0 : i32
    %c0_i32_1 = arith.constant 0 : i32
    %c0_i32_2 = arith.constant 0 : i32
    return %arg0, %c0_i32, %c0_i32_0, %c0_i32_1 : i32, i32, i32, i32
  }
  func.func @transform_1(%arg0: i32, %arg1: i32) -> (i32, i32, i32) {
    %c0_i32 = arith.constant 0 : i32
    %c0_i32_0 = arith.constant 0 : i32
    %c0_i32_1 = arith.constant 0 : i32
    return %arg1, %c0_i32, %c0_i32_0 : i32, i32, i32
  }
  func.func @transform_2(%arg0: i32, %arg1: i32) -> (i32, i32, i32) {
    %c0_i32 = arith.constant 0 : i32
    %c0_i32_0 = arith.constant 0 : i32
    %c0_i32_1 = arith.constant 0 : i32
    return %arg1, %c0_i32, %c0_i32_0 : i32, i32, i32
  }
  func.func @transform_3(%arg0: i32, %arg1: i32) -> (i32, i32, i32, i32, i32) {
    %c0_i32 = arith.constant 0 : i32
    %c0_i32_0 = arith.constant 0 : i32
    %c0_i32_1 = arith.constant 0 : i32
    %c0_i32_2 = arith.constant 0 : i32
    %c0_i32_3 = arith.constant 0 : i32
    return %arg1, %c0_i32, %c0_i32_0, %c0_i32_1, %c0_i32_2 : i32, i32, i32, i32, i32
  }
  func.func @transform_4(%arg0: i32, %arg1: i32) -> (i32, i32, i32) {
    %c0_i32 = arith.constant 0 : i32
    %c0_i32_0 = arith.constant 0 : i32
    %c0_i32_1 = arith.constant 0 : i32
    return %arg1, %c0_i32, %c0_i32_0 : i32, i32, i32
  }
  func.func @transform_5(%arg0: i32, %arg1: i32) -> (i32, i32, i32, i32) {
    %c0_i32 = arith.constant 0 : i32
    %c0_i32_0 = arith.constant 0 : i32
    %c0_i32_1 = arith.constant 0 : i32
    %c0_i32_2 = arith.constant 0 : i32
    return %arg0, %c0_i32, %c0_i32_0, %c0_i32_1 : i32, i32, i32, i32
  }
}

</mosaic_0001>

<bundles_post_ra>
// kernel: tpu_custom_call.1
= control target key start
LH: loop header
LB: loop body
LE: loop exit
PB: predicated region body
PF: predicated region fallthrough
CT: control target
= control target key end

     0   :  { %s4295_s18 = smov 0   ;;  %s4297_s19 = smov 0   ;;  %s6262_s0 = inlined_call_operand.vmem [shape: bf16[2,16,16,4], index: 0, kind: input, shape index: {}]   ;;  %s6263_s1 = inlined_call_operand.vmem [shape: bf16[2,4,2], index: 1, kind: input, shape index: {}]   ;;  %s6264_s2 = inlined_call_operand.vmem [shape: f32[2,1,2], index: 2, kind: input, shape index: {}]   ;;  %s6265_s3 = inlined_call_operand.vmem [shape: bf16[2,3,3,2,4], index: 3, kind: input, shape index: {}]   ;;  %s6266_s4 = inlined_call_operand.vmem [shape: f32[2,1,4], index: 4, kind: input, shape index: {}]   ;;  %s6267_s5 = inlined_call_operand.vmem [shape: bf16[2,16,16,4], index: 5, kind: output, shape index: {}]  }
   0x1   :  { %s4299_s20 = smov 0   ;;  %s4301_s21 = smov 0  }
   0x2   :  { %s4303_s22 = smov 0  }
   0x3 LB: > { %s24_s23 = sadd.s32 1, %s4254_s20  ;;  %s27_s24 = sadd.s32 1, %s4258_s21  ;;  %s4262_s22 = sphi %s4303_s22, %s15_s22   ;;  %s4258_s21 = sphi %s4301_s21, %s6506_s21   ;;  %s4254_s20 = sphi %s4299_s20, %s6505_s20   ;;  %s4250_s19 = sphi %s4297_s19, %s6504_s19   ;;  %s4246_s18 = sphi %s4295_s18, %s6503_s18  }
   0x4   : > { %p25_p0 = scmp.ge.s32.totalorder %s24_s23, 2  ;;  %p3367_p1 = scmp.ge.s32.totalorder %s4262_s22, 1 }
   0x5   : > { %p233_p2 = scmp.lt.s32.totalorder %s4262_s22, 5 }
   0x6   : > { %s6508_s23 = smov (%p25_p0, %s24_s23), 0  ;;  %s6510_s24 = smov (!%p25_p0, %s27_s24), %s4258_s21 }
   0x7   : > { %p234_p3 = pnand %p3367_p1, %p233_p2  ;;  %p29_p4 = scmp.ge.s32.totalorder %s6510_s24, 2 }
   0x9   : > { %s6512_s24 = smov (%p29_p4, %s6510_s24), 0  ;;  %237 = sbr.rel (%p234_p3) target bundleno = 803 (0x323), region = 40 }
   0xe   : > { %p275_p5 = scmp.lt.s32.totalorder %s4250_s19, 1  ;;  %p280_p6 = scmp.lt.s32.totalorder %s4246_s18, 1 }
   0xf   : > { %p3373_p7 = scmp.ne.s32.totalorder %s4246_s18, 0 }
  0x10   : > { %s6514_s19 = smov (!%p275_p5, %s4250_s19), 1 }
  0x11   : > { %s4329_s25 = scalar_select %p280_p6, %s4246_s18, 1 }
  0x12   : > { %s3580_s26 = sshll.u32 %s6514_s19, 7 }
  0x13   : > { %s4334_s29 = scalar_lea.vmem %s6262_s0, %s3580_s26  ;;  %s3370_s30 = sshll.u32 %s4329_s25, 1 }
  0x14   : > { %s4340_s8 = scalar_lea.vmem %s6263_s1, %s3370_s30  ;;  %s286_s11 = scalar_lea.vmem %s6264_s2, %s4329_s25 }
  0x15   : > { %s4134_s12 = smul.u32 9, %s4329_s25  ;;  %s293_s15 = scalar_lea.vmem %s6266_s4, %s4329_s25 }
  0x16   : > { %s4354_s19 = scalar_lea.vmem %s6267_s5, %s3580_s26  ;;  %303 = sbr.rel (%p3373_p7) target bundleno = 49 (0x31), region = 44 }
  0x17   : > { %s4359_s6 = scalar_lea.vmem %s6265_s3, %s4134_s12 }
  0x1b   : > { %v304_v0 = vld [vmem:[%s4334_s29] sm:$0xf]  ;;  %vm336_vm0 = vcmask 27648   ;;  %v305_v1 = vld [vmem:[%s4334_s29 + $0x4] sm:$0xf] }
  0x1c   : > { %337 = vst.msk [vmem:[#allocation2] sm:$0xf] %vm336_vm0, %v304_v0  ;;  %338 = vst.msk [vmem:[#allocation2 + $0x4] sm:$0xf] %vm336_vm0, %v305_v1  ;;  %v306_v2 = vld [vmem:[%s4334_s29 + $0x8] sm:$0xf] }
  0x1d   : > { %v307_v3 = vld [vmem:[%s4334_s29 + $0xc] sm:$0xf]  ;;  %v308_v4 = vld [vmem:[%s4334_s29 + $0x10] sm:$0xf]  ;;  %339 = vst.msk [vmem:[#allocation2 + $0x8] sm:$0xf] %vm336_vm0, %v306_v2 }
  0x1e   : > { %340 = vst.msk [vmem:[#allocation2 + $0xc] sm:$0xf] %vm336_vm0, %v307_v3  ;;  %341 = vst.msk [vmem:[#allocation2 + $0x10] sm:$0xf] %vm336_vm0, %v308_v4  ;;  %v309_v5 = vld [vmem:[%s4334_s29 + $0x14] sm:$0xf] }
  0x1f   : > { %v310_v6 = vld [vmem:[%s4334_s29 + $0x18] sm:$0xf]  ;;  %v311_v7 = vld [vmem:[%s4334_s29 + $0x1c] sm:$0xf]  ;;  %342 = vst.msk [vmem:[#allocation2 + $0x14] sm:$0xf] %vm336_vm0, %v309_v5 }
  0x20   : > { %343 = vst.msk [vmem:[#allocation2 + $0x18] sm:$0xf] %vm336_vm0, %v310_v6  ;;  %344 = vst.msk [vmem:[#allocation2 + $0x1c] sm:$0xf] %vm336_vm0, %v311_v7  ;;  %v312_v8 = vld [vmem:[%s4334_s29 + $0x20] sm:$0xf] }
  0x21   : > { %v313_v9 = vld [vmem:[%s4334_s29 + $0x24] sm:$0xf]  ;;  %v314_v10 = vld [vmem:[%s4334_s29 + $0x28] sm:$0xf]  ;;  %345 = vst.msk [vmem:[#allocation2 + $0x20] sm:$0xf] %vm336_vm0, %v312_v8 }
  0x22   : > { %346 = vst.msk [vmem:[#allocation2 + $0x24] sm:$0xf] %vm336_vm0, %v313_v9  ;;  %347 = vst.msk [vmem:[#allocation2 + $0x28] sm:$0xf] %vm336_vm0, %v314_v10  ;;  %v315_v11 = vld [vmem:[%s4334_s29 + $0x2c] sm:$0xf] }
  0x23   : > { %v316_v12 = vld [vmem:[%s4334_s29 + $0x30] sm:$0xf]  ;;  %v317_v13 = vld [vmem:[%s4334_s29 + $0x34] sm:$0xf]  ;;  %348 = vst.msk [vmem:[#allocation2 + $0x2c] sm:$0xf] %vm336_vm0, %v315_v11 }
  0x24   : > { %349 = vst.msk [vmem:[#allocation2 + $0x30] sm:$0xf] %vm336_vm0, %v316_v12  ;;  %350 = vst.msk [vmem:[#allocation2 + $0x34] sm:$0xf] %vm336_vm0, %v317_v13  ;;  %v318_v14 = vld [vmem:[%s4334_s29 + $0x38] sm:$0xf] }
  0x25   : > { %v319_v15 = vld [vmem:[%s4334_s29 + $0x3c] sm:$0xf]  ;;  %v320_v16 = vld [vmem:[%s4334_s29 + $0x40] sm:$0xf]  ;;  %351 = vst.msk [vmem:[#allocation2 + $0x38] sm:$0xf] %vm336_vm0, %v318_v14 }
  0x26   : > { %352 = vst.msk [vmem:[#allocation2 + $0x3c] sm:$0xf] %vm336_vm0, %v319_v15  ;;  %353 = vst.msk [vmem:[#allocation2 + $0x40] sm:$0xf] %vm336_vm0, %v320_v16  ;;  %v321_v17 = vld [vmem:[%s4334_s29 + $0x44] sm:$0xf] }
  0x27   : > { %v322_v18 = vld [vmem:[%s4334_s29 + $0x48] sm:$0xf]  ;;  %v323_v19 = vld [vmem:[%s4334_s29 + $0x4c] sm:$0xf]  ;;  %354 = vst.msk [vmem:[#allocation2 + $0x44] sm:$0xf] %vm336_vm0, %v321_v17 }
  0x28   : > { %355 = vst.msk [vmem:[#allocation2 + $0x48] sm:$0xf] %vm336_vm0, %v322_v18  ;;  %356 = vst.msk [vmem:[#allocation2 + $0x4c] sm:$0xf] %vm336_vm0, %v323_v19  ;;  %v324_v20 = vld [vmem:[%s4334_s29 + $0x50] sm:$0xf] }
  0x29   : > { %v325_v21 = vld [vmem:[%s4334_s29 + $0x54] sm:$0xf]  ;;  %v326_v22 = vld [vmem:[%s4334_s29 + $0x58] sm:$0xf]  ;;  %357 = vst.msk [vmem:[#allocation2 + $0x50] sm:$0xf] %vm336_vm0, %v324_v20 }
  0x2a   : > { %358 = vst.msk [vmem:[#allocation2 + $0x54] sm:$0xf] %vm336_vm0, %v325_v21  ;;  %359 = vst.msk [vmem:[#allocation2 + $0x58] sm:$0xf] %vm336_vm0, %v326_v22  ;;  %v327_v23 = vld [vmem:[%s4334_s29 + $0x5c] sm:$0xf] }
  0x2b   : > { %v328_v24 = vld [vmem:[%s4334_s29 + $0x60] sm:$0xf]  ;;  %v329_v25 = vld [vmem:[%s4334_s29 + $0x64] sm:$0xf]  ;;  %360 = vst.msk [vmem:[#allocation2 + $0x5c] sm:$0xf] %vm336_vm0, %v327_v23 }
  0x2c   : > { %361 = vst.msk [vmem:[#allocation2 + $0x60] sm:$0xf] %vm336_vm0, %v328_v24  ;;  %362 = vst.msk [vmem:[#allocation2 + $0x64] sm:$0xf] %vm336_vm0, %v329_v25  ;;  %v330_v26 = vld [vmem:[%s4334_s29 + $0x68] sm:$0xf] }
  0x2d   : > { %v331_v27 = vld [vmem:[%s4334_s29 + $0x6c] sm:$0xf]  ;;  %v332_v28 = vld [vmem:[%s4334_s29 + $0x70] sm:$0xf]  ;;  %363 = vst.msk [vmem:[#allocation2 + $0x68] sm:$0xf] %vm336_vm0, %v330_v26 }
  0x2e   : > { %364 = vst.msk [vmem:[#allocation2 + $0x6c] sm:$0xf] %vm336_vm0, %v331_v27  ;;  %365 = vst.msk [vmem:[#allocation2 + $0x70] sm:$0xf] %vm336_vm0, %v332_v28  ;;  %v333_v29 = vld [vmem:[%s4334_s29 + $0x74] sm:$0xf] }
  0x2f   : > { %v334_v30 = vld [vmem:[%s4334_s29 + $0x78] sm:$0xf]  ;;  %v335_v31 = vld [vmem:[%s4334_s29 + $0x7c] sm:$0xf]  ;;  %366 = vst.msk [vmem:[#allocation2 + $0x74] sm:$0xf] %vm336_vm0, %v333_v29 }
  0x30   : > { %367 = vst.msk [vmem:[#allocation2 + $0x78] sm:$0xf] %vm336_vm0, %v334_v30  ;;  %368 = vst.msk [vmem:[#allocation2 + $0x7c] sm:$0xf] %vm336_vm0, %v335_v31 }
  0x31 PF: > { %v401_v32 = vld [vmem:[%s4340_s8] sm:$0x3]  ;;  %vm538_vm1 = vcmask 1041408   ;;  %vm489_vm2 = vcmask 31744   ;;  %v371_v34 = vld [vmem:[#allocation2 + $0x8] sm:$0xff]   ;;  %v373_v36 = vld [vmem:[#allocation2 + $0x10] sm:$0xff]   ;;  %v776_v57 = vlaneseq }
  0x32   : > { %v369_v33 = vld [vmem:[#allocation2] sm:$0xff]   ;;  %4124 = vmatprep.subr.msk.bf16.mxu0 %vm538_vm1, %v401_v32  ;;  %v540_v35 = vsel %vm538_vm1, %v401_v32, 0  ;;  %v375_v37 = vld [vmem:[#allocation2 + $0x18] sm:$0xff]   ;;  %v379_v39 = vld [vmem:[#allocation2 + $0x28] sm:$0xff]   ;;  %vm1089_vm3 = vcmask 1040384   ;;  %v6268_v54 = vmov 0.0|0.0  }
  0x33   : > { %3785 = vmatpush3.bf16.msra.mxu0 %v540_v35  ;;  %3786 = vmatprep.mubr.msk.bf16.mxu0 %vm489_vm2, %v369_v33  ;;  %v377_v38 = vld [vmem:[#allocation2 + $0x20] sm:$0xff]   ;;  %v381_v40 = vld [vmem:[#allocation2 + $0x30] sm:$0xff]   ;;  %v383_v41 = vld [vmem:[#allocation2 + $0x38] sm:$0xff]   ;;  %v4462_v61 = vshrl.u32 %v776_v57, 7  ;;  %vm1040_vm8 = vcmask 15360   ;;  %vm3190_vm9 = vcmask 27648  }
  0x34   : > { %v385_v42 = vld [vmem:[#allocation2 + $0x40] sm:$0xff]   ;;  %v387_v43 = vld [vmem:[#allocation2 + $0x48] sm:$0xff]   ;;  %v389_v44 = vld [vmem:[#allocation2 + $0x50] sm:$0xff]  }
  0x35   : > { %v391_v45 = vld [vmem:[#allocation2 + $0x58] sm:$0xff]   ;;  %v393_v46 = vld [vmem:[#allocation2 + $0x60] sm:$0xff]   ;;  %v395_v47 = vld [vmem:[#allocation2 + $0x68] sm:$0xff]   ;;  %v4467_v3 = vadd.s32 8, %v4462_v61  ;;  %vm813_vm4 = vcmp.lt.s32.totalorder %v4462_v61, 1  ;;  %vm918_vm5 = vcmp.lt.s32.totalorder %v4462_v61, 7 }
  0x36   : > { %3787 = vmatmul.mubr.msk.bf16.vlgmr.msra.gmra.mxu0 %vm489_vm2, %v371_v34  ;;  %v397_v48 = vld [vmem:[#allocation2 + $0x70] sm:$0xff]   ;;  %v767_v50 = vld [vmem:[%s4359_s6] sm:$0x1]  ;;  %v768_v51 = vld [vmem:[%s4359_s6 + $0x1] sm:$0x1]  ;;  %vm779_vm7 = vcmp.ge.s32.totalorder %v4462_v61, 1 }
  0x37   : > { %3790 = vmatprep.mubr.msk.bf16.mxu0 %vm489_vm2, %v373_v36  ;;  %v399_v49 = vld [vmem:[#allocation2 + $0x78] sm:$0xff]   ;;  %4126 = vmatprep.subr.msk.bf16.mxu0 %vm1089_vm3, %v767_v50  ;;  %v1258_v52 = vsel %vm1089_vm3, %v767_v50, 0  ;;  %v1091_v53 = vsel %vm1089_vm3, %v768_v51, 0  ;;  %v769_v55 = vld [vmem:[%s4359_s6 + $0x2] sm:$0x1]  ;;  %vm885_vm6 = vcmp.le.s32.totalorder %v4467_v3, 14 }
  0x38   : > { %4125 = vmatprep.subr.msk.bf16.mxu1 %vm1089_vm3, %v768_v51  ;;  %3853 = vmatpush3.bf16.msra.mxu0 %v1258_v52  ;;  %v770_v56 = vld [vmem:[%s4359_s6 + $0x3] sm:$0x1]  ;;  %v4459_v58 = vld [vmem:[%s286_s11] ss:$0 sm:$0xff]  ;;  %v4476_v15 = vsel %vm1089_vm3, %v769_v55, 0 }
  0x39   : > { %3819 = vmatpush3.bf16.msra.mxu1 %v1091_v53  ;;  %4128 = vmatprep.subr.msk.bf16.mxu0 %vm1089_vm3, %v770_v56  ;;  %v4479_v16 = vsel %vm1089_vm3, %v770_v56, 0  ;;  %v774_v61 = vld [vmem:[%s4359_s6 + $0x7] sm:$0x1]  ;;  %v773_v3 = vld [vmem:[%s4359_s6 + $0x6] sm:$0x1] }
  0x3a   : > { %4127 = vmatprep.subr.msk.bf16.mxu1 %vm1089_vm3, %v769_v55 }
  0x3e   : > { %3791 = vmatmul.mubr.msk.bf16.gmra.mxu0 %vm489_vm2, %v375_v37 }
  0x3f   : > { %3794 = vmatprep.mubr.msk.bf16.mxu0 %vm489_vm2, %v377_v38 }
  0x46   : > { %3795 = vmatmul.mubr.msk.bf16.gmra.mxu0 %vm489_vm2, %v379_v39 }
  0x47   : > { %3798 = vmatprep.mubr.msk.bf16.mxu0 %vm489_vm2, %v381_v40 }
  0x4e   : > { %3799 = vmatmul.mubr.msk.bf16.gmra.mxu0 %vm489_vm2, %v383_v41 }
  0x4f   : > { %3802 = vmatprep.mubr.msk.bf16.mxu0 %vm489_vm2, %v385_v42 }
  0x56   : > { %3803 = vmatmul.mubr.msk.bf16.gmra.mxu0 %vm489_vm2, %v387_v43 }
  0x57   : > { %3806 = vmatprep.mubr.msk.bf16.mxu0 %vm489_vm2, %v389_v44 }
  0x5e   : > { %3807 = vmatmul.mubr.msk.bf16.gmra.mxu0 %vm489_vm2, %v391_v45 }
  0x5f   : > { %3810 = vmatprep.mubr.msk.bf16.mxu0 %vm489_vm2, %v393_v46 }
  0x66   : > { %3811 = vmatmul.mubr.msk.bf16.gmra.mxu0 %vm489_vm2, %v395_v47 }
  0x67   : > { %3814 = vmatprep.mubr.msk.bf16.mxu0 %vm489_vm2, %v397_v48 }
  0x6e   : > { %3815 = vmatmul.mubr.msk.bf16.gmra.mxu0 %vm489_vm2, %v399_v49 }
  0x6f   : > { %3854 = vmatprep.mubr.bf16.mxu0 %v6268_v54 }
  0xf6   : > { %v3788_v59 = vpop.f32.mrf.mxu0 }
  0xf7   : > { %v585_v60 = vadd.f32 %v3788_v59, %v4459_v58 }
  0xf8   : > { %v576_v62 = vpop.f32.mrf.mxu0 }
  0xf9   : > { %v705_v63 = vmul.f32 0.1, %v585_v60  ;;  %v577_v0 = vadd.f32 %v4459_v58, %v576_v62 }
  0xfa   : > { %v3789_v1 = vpop.f32.mrf.mxu0 }
  0xfb   : > { %v588_v2 = vadd.f32 %v3789_v1, %v4459_v58  ;;  %v737_v4 = vmax.f32 %v585_v60, %v705_v63  ;;  %v703_v6 = vmul.f32 0.1, %v577_v0 }
  0xfc   : > { %v579_v5 = vpop.f32.mrf.mxu0 }
  0xfd   : > { %v706_v7 = vmul.f32 0.1, %v588_v2  ;;  %v580_v8 = vadd.f32 %v4459_v58, %v579_v5  ;;  %v887_v12 = vrot.slane %v737_v4, 1  ;;  %v4481_v17 = vmax.f32 %v577_v0, %v703_v6 }
  0xfe   : > { %v3792_v9 = vpop.f32.mrf.mxu0  ;;  %v782_v21 = vrot.slane %v737_v4, 7 }
  0xff   : > { %v738_v10 = vmax.f32 %v588_v2, %v706_v7  ;;  %v601_v11 = vadd.f32 %v3792_v9, %v4459_v58  ;;  %v704_v13 = vmul.f32 0.1, %v580_v8  ;;  %v6271_v35 = vrot.slane %v4481_v17, 1 }
 0x100   : > { %v592_v14 = vpop.f32.mrf.mxu0  ;;  %v781_v38 = vrot.slane %v4481_v17, 7 }
 0x101   : > { %v903_v18 = vrot.slane %v738_v10, 1  ;;  %v4483_v19 = vpack.c.bf16 %v738_v10, %v737_v4  ;;  %v709_v20 = vmul.f32 0.1, %v601_v11  ;;  %v798_v22 = vrot.slane %v738_v10, 7 }
 0x102   : > { %v4485_v23 = vmax.f32 %v580_v8, %v704_v13  ;;  %v593_v24 = vadd.f32 %v4459_v58, %v592_v14  ;;  %v3793_v25 = vpop.f32.mrf.mxu0 }
 0x103   : > { %v920_v26 = vsel %vm918_vm5, %v887_v12, %v903_v18  ;;  %v936_v27 = vsel %vm918_vm5, %v903_v18, %v887_v12  ;;  %v4492_v28 = vmax.f32 %v601_v11, %v709_v20  ;;  %v604_v29 = vadd.f32 %v3793_v25, %v4459_v58  ;;  %v4569_v25 = vld [vmem:[%s4359_s6 + $0x4] sm:$0x1] }
 0x104   : > { %v960_v30 = vsel %vm885_vm6, %v936_v27, 0.0  ;;  %v6270_v31 = vrot.slane %v4485_v23, 1  ;;  %v4500_v32 = vpack.c.bf16 %v4485_v23, %v4481_v17  ;;  %v707_v33 = vmul.f32 0.1, %v593_v24  ;;  %v595_v34 = vpop.f32.mrf.mxu0 }
 0x105   : > { %v4503_v36 = vpack.c.bf16 %v960_v30, %v920_v26  ;;  %v710_v37 = vmul.f32 0.1, %v604_v29  ;;  %v784_v39 = vrot.slane %v4492_v28, 7  ;;  %v596_v41 = vadd.f32 %v4459_v58, %v595_v34 }
 0x106   : > { %v4507_v40 = vmax.f32 %v593_v24, %v707_v33  ;;  %v3796_v42 = vpop.f32.mrf.mxu0  ;;  %v797_v43 = vrot.slane %v4485_v23, 7  ;;  %v831_v46 = vsel %vm813_vm4, %v798_v22, %v782_v21  ;;  %v4522_v47 = vsel %vm918_vm5, %v6271_v35, %v6270_v31  ;;  %v4578_v33 = vld [vmem:[%s4359_s6 + $0x5] sm:$0x1] }
 0x107   : > { %6293 = vst [vmem:[#allocation3_spill] sm:$0xff] %v4503_v36  ;;  %v4511_v44 = vmax.f32 %v604_v29, %v710_v37  ;;  %v617_v45 = vadd.f32 %v3796_v42, %v4459_v58  ;;  %v889_v48 = vrot.slane %v4492_v28, 1  ;;  %v708_v50 = vmul.f32 0.1, %v596_v41 }
 0x108   : > { %v783_v49 = vrot.slane %v4507_v40, 7  ;;  %v608_v51 = vpop.f32.mrf.mxu0  ;;  %v815_v52 = vsel %vm813_vm4, %v782_v21, %v798_v22  ;;  %v814_v57 = vsel %vm813_vm4, %v781_v38, %v797_v43  ;;  %v830_v62 = vsel %vm813_vm4, %v797_v43, %v781_v38 }
 0x109   : > { %v905_v53 = vrot.slane %v4511_v44, 1  ;;  %v4531_v55 = vpack.c.bf16 %v4511_v44, %v4492_v28  ;;  %v713_v56 = vmul.f32 0.1, %v617_v45  ;;  %v4535_v59 = vmax.f32 %v596_v41, %v708_v50 }
 0x10a   : > { %v609_v60 = vadd.f32 %v4459_v58, %v608_v51  ;;  %v3797_v63 = vpop.f32.mrf.mxu0  ;;  %v854_v0 = vsel %vm779_vm7, %v831_v46, 0.0  ;;  %v852_v5 = vsel %vm779_vm7, %v830_v62, 0.0  ;;  %v800_v6 = vrot.slane %v4511_v44, 7 }
 0x10b   : > { %v4544_v1 = vsel %vm918_vm5, %v889_v48, %v905_v53  ;;  %v938_v2 = vsel %vm918_vm5, %v905_v53, %v889_v48  ;;  %v4548_v4 = vmax.f32 %v617_v45, %v713_v56  ;;  %v799_v8 = vrot.slane %v4535_v59, 7 }
 0x10c   : > { %v4555_v7 = vsel %vm885_vm6, %v938_v2, 0.0  ;;  %v711_v9 = vmul.f32 0.1, %v609_v60  ;;  %v611_v10 = vpop.f32.mrf.mxu0  ;;  %v990_v13 = vpack.c.bf16 %v814_v57, %v852_v5  ;;  %v620_v14 = vadd.f32 %v3797_v63, %v4459_v58 }
 0x10d   : > { %v4563_v20 = vpack.c.bf16 %v815_v52, %v854_v0  ;;  %v612_v21 = vadd.f32 %v4459_v58, %v611_v10  ;;  %v816_v24 = vsel %vm813_vm4, %v783_v49, %v799_v8  ;;  %v786_v26 = vrot.slane %v4548_v4, 7 }
 0x10e   : > { %v4561_v18 = vmax.f32 %v609_v60, %v711_v9  ;;  %v3800_v22 = vpop.f32.mrf.mxu0  ;;  %3820 = vmatprep.mubr.msk.bf16.mxu1 %vm1040_vm8, %v990_v13  ;;  %3855 = vmatmul.mubr.msk.bf16.vlgmr.msra.gmra.mxu0 %vm1040_vm8, %v990_v13  ;;  %v714_v27 = vmul.f32 0.1, %v620_v14  ;;  %v832_v30 = vsel %vm813_vm4, %v799_v8, %v783_v49  ;;  %v891_v34 = vrot.slane %v4548_v4, 1 }
 0x10f   : > { %v633_v29 = vadd.f32 %v3800_v22, %v4459_v58  ;;  %3821 = vmatmul.mubr.msk.bf16.vlgmr.msra.gmra.mxu1 %vm1040_vm8, %v4563_v20  ;;  %3858 = vmatprep.mubr.msk.bf16.mxu0 %vm1040_vm8, %v4563_v20  ;;  %v712_v37 = vmul.f32 0.1, %v612_v21  ;;  %v856_v41 = vsel %vm779_vm7, %v832_v30, 0.0  ;;  %v817_v42 = vsel %vm813_vm4, %v784_v39, %v800_v6 }
 0x110   : > { %v624_v38 = vpop.f32.mrf.mxu0  ;;  %v4591_v43 = vmax.f32 %v620_v14, %v714_v27  ;;  %3887 = vmatpush3.bf16.msra.mxu1 %v4476_v15  ;;  %v4595_v46 = vpack.c.bf16 %v816_v24, %v856_v41  ;;  %3921 = vmatpush3.bf16.msra.mxu0 %v4479_v16  ;;  %v785_v48 = vrot.slane %v4561_v18, 7  ;;  %v4606_v15 = vpack.c.bf16 %v4535_v59, %v4507_v40 }
 0x111   : > { %v717_v44 = vmul.f32 0.1, %v633_v29  ;;  %v625_v45 = vadd.f32 %v4459_v58, %v624_v38  ;;  %v4600_v50 = vmax.f32 %v612_v21, %v712_v37  ;;  %4129 = vmatprep.subr.msk.bf16.mxu1 %vm1089_vm3, %v4569_v25  ;;  %4130 = vmatprep.subr.msk.bf16.mxu0 %vm1089_vm3, %v4578_v33  ;;  %v833_v56 = vsel %vm813_vm4, %v800_v6, %v784_v39 }
 0x112   : > { %v3801_v51 = vpop.f32.mrf.mxu0  ;;  %v907_v52 = vrot.slane %v4591_v43, 1  ;;  %v4613_v16 = vpack.c.bf16 %v4591_v43, %v4548_v4  ;;  %3824 = vmatprep.mubr.msk.bf16.mxu1 %vm1040_vm8, %v4595_v46  ;;  %v802_v57 = vrot.slane %v4591_v43, 7  ;;  %v858_v10 = vsel %vm779_vm7, %v833_v56, 0.0 }
 0x113   : > { %v4615_v53 = vmax.f32 %v633_v29, %v717_v44  ;;  %v801_v60 = vrot.slane %v4600_v50, 7  ;;  %v715_v62 = vmul.f32 0.1, %v625_v45  ;;  %v636_v63 = vadd.f32 %v3801_v51, %v4459_v58 }
 0x114   : > { %v627_v0 = vpop.f32.mrf.mxu0  ;;  %v4628_v2 = vsel %vm918_vm5, %v891_v34, %v907_v52  ;;  %v940_v5 = vsel %vm918_vm5, %v907_v52, %v891_v34  ;;  %v4644_v14 = vpack.c.bf16 %v817_v42, %v858_v10  ;;  %v835_v10 = vsel %vm813_vm4, %v802_v57, %v786_v26 }
 0x115   : > { %v788_v8 = vrot.slane %v4615_v53, 7  ;;  %v4636_v39 = vsel %vm885_vm6, %v940_v5, 0.0  ;;  %v4638_v6 = vmax.f32 %v625_v45, %v715_v62  ;;  %v718_v9 = vmul.f32 0.1, %v636_v63 }
 0x116   : > { %v3804_v13 = vpop.f32.mrf.mxu0  ;;  %3859 = vmatmul.mubr.msk.bf16.gmra.mxu0 %vm1040_vm8, %v4595_v46  ;;  %v628_v21 = vadd.f32 %v4459_v58, %v627_v0  ;;  %v818_v24 = vsel %vm813_vm4, %v785_v48, %v801_v60  ;;  %v893_v27 = vrot.slane %v4615_v53, 1  ;;  %v834_v37 = vsel %vm813_vm4, %v801_v60, %v785_v48 }
 0x117   : > { %v649_v22 = vadd.f32 %v3804_v13, %v4459_v58  ;;  %v787_v29 = vrot.slane %v4638_v6, 7  ;;  %v4652_v30 = vmax.f32 %v636_v63, %v718_v9  ;;  %3825 = vmatmul.mubr.msk.bf16.gmra.mxu1 %vm1040_vm8, %v4644_v14  ;;  %3862 = vmatprep.mubr.msk.bf16.mxu0 %vm1040_vm8, %v4644_v14  ;;  %v860_v43 = vsel %vm779_vm7, %v834_v37, 0.0 }
 0x118   : > { %v640_v34 = vpop.f32.mrf.mxu0  ;;  %v716_v38 = vmul.f32 0.1, %v628_v21  ;;  %v4669_v51 = vpack.c.bf16 %v818_v24, %v860_v43  ;;  %v819_v9 = vsel %vm813_vm4, %v786_v26, %v802_v57  ;;  %v862_v4 = vsel %vm779_vm7, %v835_v10, 0.0 }
 0x119   : > { %v721_v41 = vmul.f32 0.1, %v649_v22  ;;  %v641_v42 = vadd.f32 %v4459_v58, %v640_v34  ;;  %v909_v45 = vrot.slane %v4652_v30, 1  ;;  %v4667_v48 = vpack.c.bf16 %v4652_v30, %v4615_v53 }
 0x11a   : > { %v3805_v52 = vpop.f32.mrf.mxu0  ;;  %v4671_v56 = vmax.f32 %v628_v21, %v716_v38  ;;  %3828 = vmatprep.mubr.msk.bf16.mxu1 %vm1040_vm8, %v4669_v51  ;;  %v804_v21 = vrot.slane %v4652_v30, 7  ;;  %v4706_v57 = vpack.c.bf16 %v819_v9, %v862_v4 }
 0x11b   : > { %6294 = vst [vmem:[#allocation4_spill] sm:$0xff] %v4667_v48  ;;  %v4673_v60 = vmax.f32 %v649_v22, %v721_v41  ;;  %v719_v62 = vmul.f32 0.1, %v641_v42  ;;  %v652_v63 = vadd.f32 %v3805_v52, %v4459_v58  ;;  %v4678_v0 = vsel %vm918_vm5, %v893_v27, %v909_v45 }
 0x11c   : > { %v942_v5 = vsel %vm918_vm5, %v909_v45, %v893_v27  ;;  %v643_v13 = vpop.f32.mrf.mxu0  ;;  %v803_v24 = vrot.slane %v4671_v56, 7 }
 0x11d   : > { %v4695_v22 = vsel %vm885_vm6, %v942_v5, 0.0  ;;  %v790_v34 = vrot.slane %v4673_v60, 7  ;;  %v4700_v37 = vmax.f32 %v641_v42, %v719_v62  ;;  %v722_v38 = vmul.f32 0.1, %v652_v63 }
 0x11e   : > { %v3808_v26 = vpop.f32.mrf.mxu0  ;;  %3863 = vmatmul.mubr.msk.bf16.gmra.mxu0 %vm1040_vm8, %v4669_v51  ;;  %v644_v30 = vadd.f32 %v4459_v58, %v643_v13  ;;  %v820_v43 = vsel %vm813_vm4, %v787_v29, %v803_v24  ;;  %v895_v42 = vrot.slane %v4673_v60, 1  ;;  %v836_v5 = vsel %vm813_vm4, %v803_v24, %v787_v29 }
 0x11f   : > { %v665_v41 = vadd.f32 %v3808_v26, %v4459_v58  ;;  %v789_v45 = vrot.slane %v4700_v37, 7  ;;  %v4714_v52 = vmax.f32 %v652_v63, %v722_v38  ;;  %3829 = vmatmul.mubr.msk.bf16.gmra.mxu1 %vm1040_vm8, %v4706_v57  ;;  %3866 = vmatprep.mubr.msk.bf16.mxu0 %vm1040_vm8, %v4706_v57  ;;  %v864_v4 = vsel %vm779_vm7, %v836_v5, 0.0 }
 0x120   : > { %v656_v62 = vpop.f32.mrf.mxu0  ;;  %v720_v9 = vmul.f32 0.1, %v644_v30  ;;  %v4731_v24 = vpack.c.bf16 %v820_v43, %v864_v4 }
 0x121   : > { %v725_v10 = vmul.f32 0.1, %v665_v41  ;;  %v657_v13 = vadd.f32 %v4459_v58, %v656_v62  ;;  %v911_v38 = vrot.slane %v4714_v52, 1  ;;  %v4729_v29 = vpack.c.bf16 %v4714_v52, %v4673_v60 }
 0x122   : > { %6296 = vst [vmem:[#allocation6_spill] sm:$0xff] %v4731_v24  ;;  %v3809_v26 = vpop.f32.mrf.mxu0  ;;  %v4733_v54 = vmax.f32 %v644_v30, %v720_v9  ;;  %3832 = vmatprep.mubr.msk.bf16.mxu1 %vm1040_vm8, %v4731_v24  ;;  %v821_v30 = vsel %vm813_vm4, %v788_v8, %v804_v21  ;;  %v806_v9 = vrot.slane %v4714_v52, 7 }
 0x123   : > { %6295 = vst [vmem:[#allocation5_spill] sm:$0xff] %v4729_v29  ;;  %v4735_v44 = vmax.f32 %v665_v41, %v725_v10  ;;  %v723_v27 = vmul.f32 0.1, %v657_v13  ;;  %v668_v62 = vadd.f32 %v3809_v26, %v4459_v58  ;;  %v4740_v5 = vsel %vm918_vm5, %v895_v42, %v911_v38 }
 0x124   : > { %v944_v63 = vsel %vm918_vm5, %v911_v38, %v895_v42  ;;  %v837_v41 = vsel %vm813_vm4, %v804_v21, %v788_v8  ;;  %v659_v43 = vpop.f32.mrf.mxu0  ;;  %v805_v42 = vrot.slane %v4733_v54, 7 }
 0x125   : > { %v4757_v10 = vsel %vm885_vm6, %v944_v63, 0.0  ;;  %v4762_v26 = vmax.f32 %v657_v13, %v723_v27  ;;  %v726_v49 = vmul.f32 0.1, %v668_v62  ;;  %v866_v53 = vsel %vm779_vm7, %v837_v41, 0.0 }
 0x126   : > { %v3812_v8 = vpop.f32.mrf.mxu0  ;;  %3867 = vmatmul.mubr.msk.bf16.gmra.mxu0 %vm1040_vm8, %v4731_v24  ;;  %v4768_v21 = vpack.c.bf16 %v821_v30, %v866_v53  ;;  %v660_v52 = vadd.f32 %v4459_v58, %v659_v43  ;;  %v822_v4 = vsel %vm813_vm4, %v789_v45, %v805_v42  ;;  %v897_v27 = vrot.slane %v4735_v44, 1 }
 0x127   : > { %v681_v63 = vadd.f32 %v3812_v8, %v4459_v58  ;;  %v791_v13 = vrot.slane %v4762_v26, 7  ;;  %v4776_v28 = vmax.f32 %v668_v62, %v726_v49  ;;  %v838_v11 = vsel %vm813_vm4, %v805_v42, %v789_v45 }
 0x128   : > { %6297 = vst [vmem:[#allocation7_spill] sm:$0xff] %v4768_v21  ;;  %v672_v41 = vpop.f32.mrf.mxu0  ;;  %3833 = vmatmul.mubr.msk.bf16.gmra.mxu1 %vm1040_vm8, %v4768_v21  ;;  %3870 = vmatprep.mubr.msk.bf16.mxu0 %vm1040_vm8, %v4768_v21  ;;  %v724_v30 = vmul.f32 0.1, %v660_v52  ;;  %v868_v8 = vsel %vm779_vm7, %v838_v11, 0.0 }
 0x129   : > { %v729_v43 = vmul.f32 0.1, %v681_v63  ;;  %v673_v53 = vadd.f32 %v4459_v58, %v672_v41  ;;  %v913_v62 = vrot.slane %v4776_v28, 1  ;;  %v4791_v45 = vpack.c.bf16 %v4776_v28, %v4735_v44 }
 0x12a   : > { %v4793_v42 = vpack.c.bf16 %v822_v4, %v868_v8  ;;  %v3813_v12 = vpop.f32.mrf.mxu0  ;;  %v4795_v31 = vmax.f32 %v660_v52, %v724_v30  ;;  %v823_v4 = vsel %vm813_vm4, %v790_v34, %v806_v9 }
 0x12b   : > { %6298 = vst [vmem:[#allocation8_spill] sm:$0xff] %v4791_v45  ;;  %v4797_v35 = vmax.f32 %v681_v63, %v729_v43  ;;  %v727_v38 = vmul.f32 0.1, %v673_v53  ;;  %v684_v41 = vadd.f32 %v3813_v12, %v4459_v58  ;;  %v4802_v11 = vsel %vm918_vm5, %v897_v27, %v913_v62 }
 0x12c   : > { %6299 = vst [vmem:[#allocation9_spill] sm:$0xff] %v4793_v42  ;;  %v946_v49 = vsel %vm918_vm5, %v913_v62, %v897_v27  ;;  %3836 = vmatprep.mubr.msk.bf16.mxu1 %vm1040_vm8, %v4793_v42  ;;  %v839_v12 = vsel %vm813_vm4, %v806_v9, %v790_v34  ;;  %v675_v52 = vpop.f32.mrf.mxu0  ;;  %v808_v63 = vrot.slane %v4776_v28, 7  ;;  %v807_v27 = vrot.slane %v4795_v31, 7 }
 0x12d   : > { %v4819_v30 = vsel %vm885_vm6, %v946_v49, 0.0  ;;  %v794_v8 = vrot.slane %v4797_v35, 7  ;;  %v4824_v62 = vmax.f32 %v673_v53, %v727_v38  ;;  %v730_v36 = vmul.f32 0.1, %v684_v41 }
 0x12e   : > { %v870_v60 = vsel %vm779_vm7, %v839_v12, 0.0  ;;  %v3816_v34 = vpop.f32.mrf.mxu0  ;;  %3871 = vmatmul.mubr.msk.bf16.gmra.mxu0 %vm1040_vm8, %v4793_v42  ;;  %v676_v9 = vadd.f32 %v4459_v58, %v675_v52  ;;  %v824_v43 = vsel %vm813_vm4, %v791_v13, %v807_v27  ;;  %v899_v38 = vrot.slane %v4797_v35, 1 }
 0x12f   : > { %v4830_v28 = vpack.c.bf16 %v823_v4, %v870_v60  ;;  %v697_v49 = vadd.f32 %v3816_v34, %v4459_v58  ;;  %v793_v53 = vrot.slane %v4824_v62, 7  ;;  %v762_v45 = vmax.f32 %v684_v41, %v730_v36 }
 0x130   : > { %v688_v29 = vpop.f32.mrf.mxu0  ;;  %v840_v12 = vsel %vm813_vm4, %v807_v27, %v791_v13  ;;  %v728_v4 = vmul.f32 0.1, %v676_v9 }
 0x131   : > { %6300 = vst [vmem:[#allocation10_spill] sm:$0xff] %v4830_v28  ;;  %3837 = vmatmul.mubr.msk.bf16.gmra.mxu1 %vm1040_vm8, %v4830_v28  ;;  %3874 = vmatprep.mubr.msk.bf16.mxu0 %vm1040_vm8, %v4830_v28  ;;  %v733_v52 = vmul.f32 0.1, %v697_v49  ;;  %v689_v60 = vadd.f32 %v4459_v58, %v688_v29  ;;  %v872_v34 = vsel %vm779_vm7, %v840_v12, 0.0  ;;  %v915_v36 = vrot.slane %v762_v45, 1 }
 0x132   : > { %v4849_v41 = vpack.c.bf16 %v762_v45, %v4797_v35  ;;  %v4851_v13 = vpack.c.bf16 %v824_v43, %v872_v34  ;;  %v3817_v27 = vpop.f32.mrf.mxu0  ;;  %v4853_v48 = vmax.f32 %v676_v9, %v728_v4  ;;  %v6302_v35 = vrot.slane %v4735_v44, 7 }
 0x133   : > { %v765_v21 = vmax.f32 %v697_v49, %v733_v52  ;;  %v731_v28 = vmul.f32 0.1, %v689_v60  ;;  %v700_v24 = vadd.f32 %v3817_v27, %v4459_v58  ;;  %v4858_v29 = vsel %vm918_vm5, %v899_v38, %v915_v36 }
 0x134   : > { %6301 = vst [vmem:[#allocation11_spill] sm:$0xff] %v4849_v41  ;;  %v948_v12 = vsel %vm918_vm5, %v915_v36, %v899_v38  ;;  %3840 = vmatprep.mubr.msk.bf16.mxu1 %vm1040_vm8, %v4851_v13  ;;  %v825_v43 = vsel %vm813_vm4, %v6302_v35, %v808_v63  ;;  %v6303_v9 = vmov %v6302_v35  ;;  %v691_v4 = vpop.f32.mrf.mxu0  ;;  %v810_v52 = vrot.slane %v762_v45, 7 }
 0x135   : > { %v841_v49 = vsel %vm813_vm4, %v808_v63, %v6303_v9  ;;  %v4874_v34 = vsel %vm885_vm6, %v948_v12, 0.0  ;;  %v809_v38 = vrot.slane %v4853_v48, 7  ;;  %v796_v27 = vrot.slane %v765_v21, 7 }
 0x136   : > { %v4878_v42 = vmax.f32 %v689_v60, %v731_v28  ;;  %v734_v41 = vmul.f32 0.1, %v700_v24  ;;  %v874_v44 = vsel %vm779_vm7, %v841_v49, 0.0  ;;  %3875 = vmatmul.mubr.msk.bf16.gmra.mxu0 %vm1040_vm8, %v4851_v13  ;;  %v692_v45 = vadd.f32 %v4459_v58, %v691_v4 }
 0x137   : > { %v4884_v63 = vpack.c.bf16 %v825_v43, %v874_v44  ;;  %v826_v12 = vsel %vm813_vm4, %v793_v53, %v809_v38  ;;  %v842_v35 = vsel %vm813_vm4, %v809_v38, %v793_v53  ;;  %v901_v9 = vrot.slane %v765_v21, 1 }
 0x138   : > { %v795_v28 = vrot.slane %v4878_v42, 7  ;;  %v766_v60 = vmax.f32 %v700_v24, %v734_v41  ;;  %v876_v49 = vsel %vm779_vm7, %v842_v35, 0.0  ;;  %v732_v58 = vmul.f32 0.1, %v692_v45 }
 0x139   : > { %3841 = vmatmul.mubr.msk.bf16.gmra.mxu1 %vm1040_vm8, %v4884_v63  ;;  %3878 = vmatprep.mubr.msk.bf16.mxu0 %vm1040_vm8, %v4884_v63  ;;  %v4898_v43 = vpack.c.bf16 %v826_v12, %v876_v49  ;;  %v827_v4 = vsel %vm813_vm4, %v794_v8, %v810_v52  ;;  %v843_v53 = vsel %vm813_vm4, %v810_v52, %v794_v8 }
 0x13a   : > { %v812_v38 = vrot.slane %v766_v60, 7  ;;  %v917_v24 = vrot.slane %v766_v60, 1  ;;  %v4904_v41 = vpack.c.bf16 %v766_v60, %v765_v21  ;;  %v878_v44 = vsel %vm779_vm7, %v843_v53, 0.0 }
 0x13b   : > { %6304 = vst [vmem:[#allocation12_spill] sm:$0xff] %v4898_v43  ;;  %v4909_v36 = vmax.f32 %v692_v45, %v732_v58  ;;  %3844 = vmatprep.mubr.msk.bf16.mxu1 %vm1040_vm8, %v4898_v43  ;;  %v4915_v12 = vpack.c.bf16 %v4600_v50, %v4561_v18  ;;  %v4919_v8 = vpack.c.bf16 %v4671_v56, %v4638_v6 }
 0x13c   : > { %6305 = vst [vmem:[#allocation13_spill] sm:$0xff] %v4904_v41  ;;  %v934_v21 = vsel %vm918_vm5, %v901_v9, %v917_v24  ;;  %v950_v52 = vsel %vm918_vm5, %v917_v24, %v901_v9  ;;  %v829_v45 = vsel %vm813_vm4, %v796_v27, %v812_v38  ;;  %v845_v60 = vsel %vm813_vm4, %v812_v38, %v796_v27 }
 0x13d   : > { %v988_v49 = vsel %vm885_vm6, %v950_v52, 0.0  ;;  %v811_v58 = vrot.slane %v4909_v36, 7  ;;  %v4932_v53 = vpack.c.bf16 %v827_v4, %v878_v44  ;;  %v882_v35 = vsel %vm779_vm7, %v845_v60, 0.0 }
 0x13e   : > { %v916_v41 = vrot.slane %v4909_v36, 1  ;;  %v4939_v9 = vpack.c.bf16 %v4733_v54, %v4700_v37  ;;  %v4943_v24 = vpack.c.bf16 %v4795_v31, %v4762_v26  ;;  %v4947_v27 = vpack.c.bf16 %v4853_v48, %v4824_v62  ;;  %3879 = vmatmul.mubr.msk.bf16.gmra.mxu0 %vm1040_vm8, %v4898_v43 }
 0x13f   : > { %v828_v4 = vsel %vm813_vm4, %v795_v28, %v811_v58  ;;  %v844_v38 = vsel %vm813_vm4, %v811_v58, %v795_v28  ;;  %v4955_v44 = vpack.c.bf16 %v829_v45, %v882_v35  ;;  %v4959_v52 = vpack.c.bf16 %v4909_v36, %v4878_v42  ;;  %3882 = vmatprep.mubr.msk.bf16.mxu0 %vm1040_vm8, %v4932_v53 }
 0x140   : > { %6306 = vst [vmem:[#allocation14_spill] sm:$0xff] %v4943_v24  ;;  %6307 = vst [vmem:[#allocation15_spill] sm:$0xff] %v4947_v27  ;;  %v880_v60 = vsel %vm779_vm7, %v844_v38, 0.0  ;;  %v6308_v27 = vrot.slane %v4481_v17, 1  ;;  %v6309_v43 = vrot.slane %v4485_v23, 1  ;;  %v6310_v28 = vrot.slane %v4535_v59, 1 }
 0x141   : > { %v6311_v35 = vrot.slane %v4507_v40, 1  ;;  %3845 = vmatmul.mubr.msk.bf16.gmra.mxu1 %vm1040_vm8, %v4932_v53  ;;  %v4985_v17 = vpack.c.bf16 %v828_v4, %v880_v60  ;;  %v6315_v4 = vrot.slane %v4561_v18, 1 }
 0x142   : > { %v935_v24 = vsel %vm918_vm5, %v6309_v43, %v6308_v27  ;;  %v6313_v58 = vmov %v6310_v28  ;;  %v4993_v27 = vpack.c.bf16 %v4555_v7, %v4544_v1  ;;  %v5018_v7 = vpack.c.bf16 %v4636_v39, %v4628_v2 }
 0x143   : > { %v921_v36 = vsel %vm918_vm5, %v6311_v35, %v6310_v28  ;;  %v6312_v45 = vmov %v6311_v35  ;;  %v958_v23 = vsel %vm885_vm6, %v935_v24, 0.0  ;;  %v6314_v28 = vrot.slane %v4600_v50, 1  ;;  %3848 = vmatprep.mubr.msk.bf16.mxu1 %vm1040_vm8, %v4985_v17 }
 0x144   : > { %v937_v38 = vsel %vm918_vm5, %v6313_v58, %v6312_v45  ;;  %v4996_v40 = vpack.c.bf16 %v958_v23, %v4522_v47  ;;  %v6316_v24 = vmov %v6315_v4  ;;  %v6319_v45 = vrot.slane %v4638_v6, 1 }
 0x145   : > { %v962_v43 = vsel %vm885_vm6, %v937_v38, 0.0  ;;  %v923_v60 = vsel %vm918_vm5, %v6315_v4, %v6314_v28  ;;  %v6317_v35 = vmov %v6314_v28  ;;  %v5038_v39 = vpack.c.bf16 %v4695_v22, %v4678_v0 }
 0x146   : > { %v4998_v59 = vpack.c.bf16 %v962_v43, %v921_v36  ;;  %v939_v1 = vsel %vm918_vm5, %v6317_v35, %v6316_v24  ;;  %v6318_v36 = vrot.slane %v4671_v56, 1  ;;  %v6320_v50 = vmov %v6319_v45  ;;  %3883 = vmatmul.mubr.msk.bf16.gmra.mxu0 %vm1040_vm8, %v4985_v17 }
 0x147   : > { %v966_v47 = vsel %vm885_vm6, %v939_v1, 0.0  ;;  %v6322_v43 = vrot.slane %v4733_v54, 1  ;;  %v6323_v28 = vrot.slane %v4700_v37, 1  ;;  %v5056_v0 = vpack.c.bf16 %v4757_v10, %v4740_v5 }
 0x148   : > { %v925_v18 = vsel %vm918_vm5, %v6319_v45, %v6318_v36  ;;  %v6321_v58 = vmov %v6318_v36  ;;  %v5032_v23 = vpack.c.bf16 %v966_v47, %v923_v60  ;;  %v6326_v22 = vrot.slane %v4795_v31, 1 }
 0x149   : > { %v941_v38 = vsel %vm918_vm5, %v6321_v58, %v6320_v50  ;;  %v927_v6 = vsel %vm918_vm5, %v6323_v28, %v6322_v43  ;;  %v6324_v4 = vmov %v6323_v28  ;;  %v6325_v60 = vmov %v6322_v43  ;;  %3849 = vmatmul.mubr.msk.bf16.gmra.mxu1 %vm1040_vm8, %v4955_v44 }
 0x14a   : > { %v970_v2 = vsel %vm885_vm6, %v941_v38, 0.0  ;;  %v943_v24 = vsel %vm918_vm5, %v6325_v60, %v6324_v4  ;;  %v6327_v35 = vrot.slane %v4762_v26, 1  ;;  %v6329_v54 = vmov %v6326_v22  ;;  %3888 = vmatprep.mubr.msk.bf16.mxu1 %vm1040_vm8, %v4563_v20  ;;  %v6337_v20 = vld [vmem:[#allocation6_spill] sm:$0xff] }
 0x14b   : > { %v5046_v56 = vpack.c.bf16 %v970_v2, %v925_v18  ;;  %v974_v47 = vsel %vm885_vm6, %v943_v24, 0.0  ;;  %v5074_v5 = vpack.c.bf16 %v4819_v30, %v4802_v11  ;;  %v6330_v10 = vrot.slane %v4853_v48, 1  ;;  %v6346_v24 = vld [vmem:[#allocation15_spill] sm:$0xff] }
 0x14c   : > { %v929_v1 = vsel %vm918_vm5, %v6327_v35, %v6326_v22  ;;  %v6328_v37 = vmov %v6327_v35  ;;  %v6331_v45 = vrot.slane %v4824_v62, 1  ;;  %v5084_v26 = vpack.c.bf16 %v974_v47, %v927_v6 }
 0x14d   : > { %v945_v36 = vsel %vm918_vm5, %v6329_v54, %v6328_v37  ;;  %v6333_v11 = vmov %v6330_v10  ;;  %v5096_v58 = vpack.c.bf16 %v4874_v34, %v4858_v29  ;;  %v6334_v38 = vmov 0.0|0.0  }
 0x14e   : > { %v931_v18 = vsel %vm918_vm5, %v6331_v45, %v6330_v10  ;;  %v978_v31 = vsel %vm885_vm6, %v945_v36, 0.0  ;;  %v6332_v50 = vmov %v6331_v45  ;;  %3922 = vmatprep.mubr.bf16.mxu0 %v6334_v38  ;;  %v6335_v28 = vrot.slane %v4878_v42, 1 }
 0x14f   : > { %v947_v30 = vsel %vm918_vm5, %v6333_v11, %v6332_v50  ;;  %v5099_v2 = vpack.c.bf16 %v978_v31, %v929_v1  ;;  %v5117_v4 = vpack.c.bf16 %v988_v49, %v934_v21  ;;  %v2061_v42 = vsel %vm1089_vm3, %v4578_v33, 0  ;;  %3923 = vmatmul.mubr.msk.bf16.vlgmr.msra.gmra.mxu0 %vm1040_vm8, %v4500_v32  ;;  %v6339_v33 = vld [vmem:[#allocation4_spill] sm:$0xff] }
 0x150   : > { %v982_v43 = vsel %vm885_vm6, %v947_v30, 0.0  ;;  %v933_v48 = vsel %vm918_vm5, %v6335_v28, %v916_v41  ;;  %v6336_v62 = vmov %v6335_v28  ;;  %3926 = vmatprep.mubr.msk.bf16.mxu0 %vm1040_vm8, %v4483_v19  ;;  %3989 = vmatpush3.bf16.msra.mxu0 %v2061_v42  ;;  %v6344_v21 = vld [vmem:[#allocation8_spill] sm:$0xff] }
 0x151   : > { %v949_v6 = vsel %vm918_vm5, %v916_v41, %v6336_v62  ;;  %v5113_v29 = vpack.c.bf16 %v982_v43, %v931_v18  ;;  %v1865_v41 = vsel %vm1089_vm3, %v4569_v25, 0  ;;  %3889 = vmatmul.mubr.msk.bf16.vlgmr.msra.gmra.mxu1 %vm1040_vm8, %v4595_v46  ;;  %4132 = vmatprep.subr.msk.bf16.mxu0 %vm1089_vm3, %v774_v61  ;;  %v6338_v25 = vld [vmem:[#allocation7_spill] sm:$0xff]  ;;  %v6340_v46 = vld [vmem:[#allocation9_spill] sm:$0xff]  ;;  %v6345_v49 = vld [vmem:[#allocation12_spill] sm:$0xff] }
 0x152   : > { %v986_v34 = vsel %vm885_vm6, %v949_v6, 0.0  ;;  %3955 = vmatpush3.bf16.msra.mxu1 %v1865_v41  ;;  %3892 = vmatprep.mubr.msk.bf16.mxu1 %vm1040_vm8, %v4644_v14  ;;  %v6341_v14 = vld [vmem:[#allocation10_spill] sm:$0xff] }
 0x153   : > { %v5121_v60 = vpack.c.bf16 %v986_v34, %v933_v48  ;;  %4131 = vmatprep.subr.msk.bf16.mxu1 %vm1089_vm3, %v773_v3 }
 0x157   : > { %3927 = vmatmul.mubr.msk.bf16.gmra.mxu0 %vm1040_vm8, %v4606_v15 }
 0x158   : > { %3930 = vmatprep.mubr.msk.bf16.mxu0 %vm1040_vm8, %v4531_v55 }
 0x159   : > { %3893 = vmatmul.mubr.msk.bf16.gmra.mxu1 %vm1040_vm8, %v4669_v51  ;;  %v6342_v51 = vld [vmem:[#allocation5_spill] sm:$0xff] }
 0x15a   : > { %3896 = vmatprep.mubr.msk.bf16.mxu1 %vm1040_vm8, %v4706_v57  ;;  %v6343_v57 = vld [vmem:[#allocation14_spill] sm:$0xff] }
 0x15f   : > { %3931 = vmatmul.mubr.msk.bf16.gmra.mxu0 %vm1040_vm8, %v4915_v12 }
 0x160   : > { %3934 = vmatprep.mubr.msk.bf16.mxu0 %vm1040_vm8, %v4613_v16 }
 0x161   : > { %3897 = vmatmul.mubr.msk.bf16.gmra.mxu1 %vm1040_vm8, %v6337_v20 }
 0x162   : > { %3900 = vmatprep.mubr.msk.bf16.mxu1 %vm1040_vm8, %v6338_v25 }
 0x167   : > { %3935 = vmatmul.mubr.msk.bf16.gmra.mxu0 %vm1040_vm8, %v4919_v8 }
 0x168   : > { %3938 = vmatprep.mubr.msk.bf16.mxu0 %vm1040_vm8, %v6339_v33 }
 0x169   : > { %3901 = vmatmul.mubr.msk.bf16.gmra.mxu1 %vm1040_vm8, %v6340_v46 }
 0x16a   : > { %3904 = vmatprep.mubr.msk.bf16.mxu1 %vm1040_vm8, %v6341_v14 }
 0x16f   : > { %3939 = vmatmul.mubr.msk.bf16.gmra.mxu0 %vm1040_vm8, %v4939_v9 }
 0x170   : > { %3942 = vmatprep.mubr.msk.bf16.mxu0 %vm1040_vm8, %v6342_v51 }
 0x171   : > { %3905 = vmatmul.mubr.msk.bf16.gmra.mxu1 %vm1040_vm8, %v4851_v13  ;;  %v6347_v13 = vld [vmem:[#allocation11_spill] sm:$0xff] }
 0x172   : > { %3908 = vmatprep.mubr.msk.bf16.mxu1 %vm1040_vm8, %v4884_v63  ;;  %v2504_v63 = vsel %vm1089_vm3, %v774_v61, 0 }
 0x177   : > { %3943 = vmatmul.mubr.msk.bf16.gmra.mxu0 %vm1040_vm8, %v6343_v57 }
 0x178   : > { %3946 = vmatprep.mubr.msk.bf16.mxu0 %vm1040_vm8, %v6344_v21 }
 0x179   : > { %3909 = vmatmul.mubr.msk.bf16.gmra.mxu1 %vm1040_vm8, %v6345_v49 }
 0x17a   : > { %3912 = vmatprep.mubr.msk.bf16.mxu1 %vm1040_vm8, %v4932_v53  ;;  %v2305_v53 = vsel %vm1089_vm3, %v773_v3, 0 }
 0x17f   : > { %3947 = vmatmul.mubr.msk.bf16.gmra.mxu0 %vm1040_vm8, %v6346_v24 }
 0x180   : > { %3950 = vmatprep.mubr.msk.bf16.mxu0 %vm1040_vm8, %v6347_v13 }
 0x181   : > { %3913 = vmatmul.mubr.msk.bf16.gmra.mxu1 %vm1040_vm8, %v4985_v17 }
 0x182   : > { %3916 = vmatprep.mubr.msk.bf16.mxu1 %vm1040_vm8, %v4955_v44  ;;  %v775_v44 = vld [vmem:[%s4359_s6 + $0x8] sm:$0x1] }
 0x187   : > { %3951 = vmatmul.mubr.msk.bf16.gmra.mxu0 %vm1040_vm8, %v4959_v52 }
 0x188   : > { %3990 = vmatprep.mubr.msk.bf16.mxu0 %vm1040_vm8, %v4483_v19 }
 0x189   : > { %3917 = vmatmul.mubr.bf16.gmra.mxu1 %v6334_v38 }
 0x18a   : > { %3956 = vmatprep.mubr.msk.bf16.mxu1 %vm1040_vm8, %v4500_v32 }
 0x18f   : > { %3991 = vmatmul.mubr.msk.bf16.vlgmr.msra.gmra.mxu0 %vm1040_vm8, %v4606_v15 }
 0x190   : > { %3994 = vmatprep.mubr.msk.bf16.mxu0 %vm1040_vm8, %v4531_v55  ;;  %4057 = vmatpush3.bf16.msra.mxu0 %v2504_v63 }
 0x191   : > { %3957 = vmatmul.mubr.msk.bf16.vlgmr.msra.gmra.mxu1 %vm1040_vm8, %v4483_v19  ;;  %v6348_v19 = vld [vmem:[#allocation13_spill] sm:$0xff] }
 0x192   : > { %4023 = vmatpush3.bf16.msra.mxu1 %v2305_v53  ;;  %3960 = vmatprep.mubr.msk.bf16.mxu1 %vm1040_vm8, %v4606_v15  ;;  %v2700_v15 = vsel %vm1089_vm3, %v775_v44, 0 }
 0x193   : > { %4133 = vmatprep.subr.msk.bf16.mxu1 %vm1089_vm3, %v775_v44 }
 0x197   : > { %3995 = vmatmul.mubr.msk.bf16.gmra.mxu0 %vm1040_vm8, %v4915_v12 }
 0x198   : > { %3998 = vmatprep.mubr.msk.bf16.mxu0 %vm1040_vm8, %v4613_v16 }
 0x199   : > { %3961 = vmatmul.mubr.msk.bf16.gmra.mxu1 %vm1040_vm8, %v4531_v55  ;;  %v6349_v55 = vld [vmem:[#allocation3_spill] sm:$0xff] }
 0x19a   : > { %3964 = vmatprep.mubr.msk.bf16.mxu1 %vm1040_vm8, %v4915_v12 }
 0x19f   : > { %3999 = vmatmul.mubr.msk.bf16.gmra.mxu0 %vm1040_vm8, %v4919_v8 }
 0x1a0   : > { %4002 = vmatprep.mubr.msk.bf16.mxu0 %vm1040_vm8, %v6339_v33 }
 0x1a1   : > { %3965 = vmatmul.mubr.msk.bf16.gmra.mxu1 %vm1040_vm8, %v4613_v16 }
 0x1a2   : > { %3968 = vmatprep.mubr.msk.bf16.mxu1 %vm1040_vm8, %v4919_v8 }
 0x1a7   : > { %4003 = vmatmul.mubr.msk.bf16.gmra.mxu0 %vm1040_vm8, %v4939_v9 }
 0x1a8   : > { %4006 = vmatprep.mubr.msk.bf16.mxu0 %vm1040_vm8, %v6342_v51 }
 0x1a9   : > { %3969 = vmatmul.mubr.msk.bf16.gmra.mxu1 %vm1040_vm8, %v6339_v33 }
 0x1aa   : > { %3972 = vmatprep.mubr.msk.bf16.mxu1 %vm1040_vm8, %v4939_v9 }
 0x1af   : > { %4007 = vmatmul.mubr.msk.bf16.gmra.mxu0 %vm1040_vm8, %v6343_v57 }
 0x1b0   : > { %4010 = vmatprep.mubr.msk.bf16.mxu0 %vm1040_vm8, %v6344_v21 }
 0x1b1   : > { %3973 = vmatmul.mubr.msk.bf16.gmra.mxu1 %vm1040_vm8, %v6342_v51 }
 0x1b2   : > { %3976 = vmatprep.mubr.msk.bf16.mxu1 %vm1040_vm8, %v6343_v57 }
 0x1b7   : > { %4011 = vmatmul.mubr.msk.bf16.gmra.mxu0 %vm1040_vm8, %v6346_v24 }
 0x1b8   : > { %4014 = vmatprep.mubr.msk.bf16.mxu0 %vm1040_vm8, %v6347_v13 }
 0x1b9   : > { %3977 = vmatmul.mubr.msk.bf16.gmra.mxu1 %vm1040_vm8, %v6344_v21 }
 0x1ba   : > { %3980 = vmatprep.mubr.msk.bf16.mxu1 %vm1040_vm8, %v6346_v24 }
 0x1bf   : > { %4015 = vmatmul.mubr.msk.bf16.gmra.mxu0 %vm1040_vm8, %v4959_v52 }
 0x1c0   : > { %4018 = vmatprep.mubr.msk.bf16.mxu0 %vm1040_vm8, %v6348_v19 }
 0x1c1   : > { %3981 = vmatmul.mubr.msk.bf16.gmra.mxu1 %vm1040_vm8, %v6347_v13 }
 0x1c2   : > { %3984 = vmatprep.mubr.msk.bf16.mxu1 %vm1040_vm8, %v4959_v52 }
 0x1c7   : > { %4019 = vmatmul.mubr.bf16.gmra.mxu0 %v6334_v38 }
 0x1c8   : > { %4058 = vmatprep.mubr.msk.bf16.mxu0 %vm1040_vm8, %v4996_v40 }
 0x1c9   : > { %3985 = vmatmul.mubr.msk.bf16.gmra.mxu1 %vm1040_vm8, %v6348_v19 }
 0x1ca   : > { %4024 = vmatprep.mubr.bf16.mxu1 %v6334_v38 }
 0x1ce   : > { %v3856_v32 = vpop.f32.mrf.mxu0 }
 0x1cf   : > { %4059 = vmatmul.mubr.msk.bf16.vlgmr.msra.gmra.mxu0 %vm1040_vm8, %v6349_v55  ;;  %v3822_v16 = vpop.f32.mrf.mxu1 }
 0x1d0   : > { %4062 = vmatprep.mubr.msk.bf16.mxu0 %vm1040_vm8, %v4998_v59  ;;  %v5265_v12 = vadd.f32 %v3856_v32, %v3822_v16  ;;  %v1294_v8 = vpop.f32.mrf.mxu0 }
 0x1d1   : > { %4025 = vmatmul.mubr.msk.bf16.vlgmr.msra.gmra.mxu1 %vm1040_vm8, %v4996_v40  ;;  %v1127_v9 = vpop.f32.mrf.mxu1 }
 0x1d2   : > { %4091 = vmatpush3.bf16.msra.mxu1 %v2700_v15  ;;  %4028 = vmatprep.mubr.msk.bf16.mxu1 %vm1040_vm8, %v6349_v55  ;;  %v5271_v52 = vadd.f32 %v1294_v8, %v1127_v9  ;;  %v3857_v17 = vpop.f32.mrf.mxu0 }
 0x1d3   : > { %v3823_v22 = vpop.f32.mrf.mxu1 }
 0x1d4   : > { %v5273_v35 = vadd.f32 %v3857_v17, %v3823_v22  ;;  %v1297_v1 = vpop.f32.mrf.mxu0 }
 0x1d5   : > { %v1130_v47 = vpop.f32.mrf.mxu1 }
 0x1d6   : > { %v5275_v37 = vadd.f32 %v1297_v1, %v1130_v47  ;;  %v3860_v54 = vpop.f32.mrf.mxu0 }
 0x1d7   : > { %4063 = vmatmul.mubr.msk.bf16.gmra.mxu0 %vm1040_vm8, %v4993_v27  ;;  %v3826_v40 = vpop.f32.mrf.mxu1 }
 0x1d8   : > { %4066 = vmatprep.mubr.msk.bf16.mxu0 %vm1040_vm8, %v5032_v23  ;;  %v1310_v36 = vpop.f32.mrf.mxu0  ;;  %v5283_v10 = vadd.f32 %v3860_v54, %v3826_v40 }
 0x1d9   : > { %4029 = vmatmul.mubr.msk.bf16.gmra.mxu1 %vm1040_vm8, %v4998_v59  ;;  %v1143_v45 = vpop.f32.mrf.mxu1 }
 0x1da   : > { %4032 = vmatprep.mubr.msk.bf16.mxu1 %vm1040_vm8, %v4993_v27  ;;  %v3861_v18 = vpop.f32.mrf.mxu0  ;;  %v5287_v31 = vadd.f32 %v1310_v36, %v1143_v45 }
 0x1db   : > { %v3827_v50 = vpop.f32.mrf.mxu1 }
 0x1dc   : > { %v1313_v11 = vpop.f32.mrf.mxu0  ;;  %v5289_v30 = vadd.f32 %v3861_v18, %v3827_v50 }
 0x1dd   : > { %v1146_v43 = vpop.f32.mrf.mxu1 }
 0x1de   : > { %v3864_v28 = vpop.f32.mrf.mxu0  ;;  %v5293_v48 = vadd.f32 %v1313_v11, %v1146_v43 }
 0x1df   : > { %4067 = vmatmul.mubr.msk.bf16.gmra.mxu0 %vm1040_vm8, %v5018_v7  ;;  %v3830_v62 = vpop.f32.mrf.mxu1 }
 0x1e0   : > { %4070 = vmatprep.mubr.msk.bf16.mxu0 %vm1040_vm8, %v5046_v56  ;;  %v1326_v6 = vpop.f32.mrf.mxu0  ;;  %v5299_v34 = vadd.f32 %v3864_v28, %v3830_v62 }
 0x1e1   : > { %4033 = vmatmul.mubr.msk.bf16.gmra.mxu1 %vm1040_vm8, %v5032_v23  ;;  %v1159_v42 = vpop.f32.mrf.mxu1 }
 0x1e2   : > { %4036 = vmatprep.mubr.msk.bf16.mxu1 %vm1040_vm8, %v5018_v7  ;;  %v3865_v61 = vpop.f32.mrf.mxu0  ;;  %v5303_v41 = vadd.f32 %v1326_v6, %v1159_v42 }
 0x1e3   : > { %v3831_v3 = vpop.f32.mrf.mxu1 }
 0x1e4   : > { %v1329_v20 = vpop.f32.mrf.mxu0  ;;  %v5305_v25 = vadd.f32 %v3865_v61, %v3831_v3 }
 0x1e5   : > { %v1162_v33 = vpop.f32.mrf.mxu1 }
 0x1e6   : > { %v3868_v46 = vpop.f32.mrf.mxu0  ;;  %v5309_v14 = vadd.f32 %v1329_v20, %v1162_v33 }
 0x1e7   : > { %4071 = vmatmul.mubr.msk.bf16.gmra.mxu0 %vm1040_vm8, %v5038_v39 }
 0x1e8   : > { %4074 = vmatprep.mubr.msk.bf16.mxu0 %vm1040_vm8, %v5084_v26  ;;  %v3834_v51 = vpop.f32.mrf.mxu1  ;;  %v1342_v57 = vpop.f32.mrf.mxu0 }
 0x1e9   : > { %4037 = vmatmul.mubr.msk.bf16.gmra.mxu1 %vm1040_vm8, %v5046_v56  ;;  %v5315_v21 = vadd.f32 %v3868_v46, %v3834_v51 }
 0x1ea   : > { %4040 = vmatprep.mubr.msk.bf16.mxu1 %vm1040_vm8, %v5038_v39  ;;  %v1175_v49 = vpop.f32.mrf.mxu1  ;;  %v3869_v24 = vpop.f32.mrf.mxu0 }
 0x1eb   : > { %v5319_v13 = vadd.f32 %v1342_v57, %v1175_v49 }
 0x1ec   : > { %v3835_v63 = vpop.f32.mrf.mxu1  ;;  %v1345_v53 = vpop.f32.mrf.mxu0 }
 0x1ed   : > { %v5321_v44 = vadd.f32 %v3869_v24, %v3835_v63 }
 0x1ee   : > { %v1178_v19 = vpop.f32.mrf.mxu1  ;;  %v3872_v32 = vpop.f32.mrf.mxu0 }
 0x1ef   : > { %4075 = vmatmul.mubr.msk.bf16.gmra.mxu0 %vm1040_vm8, %v5056_v0  ;;  %v5325_v15 = vadd.f32 %v1345_v53, %v1178_v19 }
 0x1f0   : > { %4078 = vmatprep.mubr.msk.bf16.mxu0 %vm1040_vm8, %v5099_v2  ;;  %v1358_v8 = vpop.f32.mrf.mxu0 }
 0x1f1   : > { %v3838_v16 = vpop.f32.mrf.mxu1  ;;  %4041 = vmatmul.mubr.msk.bf16.gmra.mxu1 %vm1040_vm8, %v5084_v26 }
 0x1f2   : > { %v5331_v9 = vadd.f32 %v3872_v32, %v3838_v16  ;;  %4044 = vmatprep.mubr.msk.bf16.mxu1 %vm1040_vm8, %v5056_v0  ;;  %v3873_v22 = vpop.f32.mrf.mxu0 }
 0x1f3   : > { %v1191_v17 = vpop.f32.mrf.mxu1 }
 0x1f4   : > { %v5335_v1 = vadd.f32 %v1358_v8, %v1191_v17  ;;  %v1361_v54 = vpop.f32.mrf.mxu0 }
 0x1f5   : > { %v3839_v47 = vpop.f32.mrf.mxu1 }
 0x1f6   : > { %v5337_v40 = vadd.f32 %v3873_v22, %v3839_v47  ;;  %v3876_v45 = vpop.f32.mrf.mxu0 }
 0x1f7   : > { %v1194_v36 = vpop.f32.mrf.mxu1  ;;  %4079 = vmatmul.mubr.msk.bf16.gmra.mxu0 %vm1040_vm8, %v5074_v5 }
 0x1f8   : > { %v5341_v18 = vadd.f32 %v1361_v54, %v1194_v36  ;;  %4082 = vmatprep.mubr.msk.bf16.mxu0 %vm1040_vm8, %v5113_v29  ;;  %v1374_v11 = vpop.f32.mrf.mxu0 }
 0x1f9   : > { %v3842_v50 = vpop.f32.mrf.mxu1  ;;  %4045 = vmatmul.mubr.msk.bf16.gmra.mxu1 %vm1040_vm8, %v5099_v2 }
 0x1fa   : > { %v5347_v43 = vadd.f32 %v3876_v45, %v3842_v50  ;;  %4048 = vmatprep.mubr.msk.bf16.mxu1 %vm1040_vm8, %v5074_v5  ;;  %v3877_v62 = vpop.f32.mrf.mxu0 }
 0x1fb   : > { %v1207_v28 = vpop.f32.mrf.mxu1 }
 0x1fc   : > { %v5351_v6 = vadd.f32 %v1374_v11, %v1207_v28  ;;  %v1377_v61 = vpop.f32.mrf.mxu0 }
 0x1fd   : > { %v3843_v42 = vpop.f32.mrf.mxu1 }
 0x1fe   : > { %v5353_v3 = vadd.f32 %v3877_v62, %v3843_v42  ;;  %v3880_v33 = vpop.f32.mrf.mxu0 }
 0x1ff   : > { %v1210_v20 = vpop.f32.mrf.mxu1  ;;  %4083 = vmatmul.mubr.msk.bf16.gmra.mxu0 %vm1040_vm8, %v5096_v58 }
 0x200   : > { %v5357_v46 = vadd.f32 %v1377_v61, %v1210_v20  ;;  %4086 = vmatprep.mubr.msk.bf16.mxu0 %vm1040_vm8, %v5121_v60  ;;  %v1390_v57 = vpop.f32.mrf.mxu0 }
 0x201   : > { %v3846_v51 = vpop.f32.mrf.mxu1  ;;  %4049 = vmatmul.mubr.msk.bf16.gmra.mxu1 %vm1040_vm8, %v5113_v29 }
 0x202   : > { %v5363_v49 = vadd.f32 %v3880_v33, %v3846_v51  ;;  %4052 = vmatprep.mubr.msk.bf16.mxu1 %vm1040_vm8, %v5096_v58  ;;  %v3881_v63 = vpop.f32.mrf.mxu0 }
 0x203   : > { %v1223_v24 = vpop.f32.mrf.mxu1 }
 0x204   : > { %v5367_v53 = vadd.f32 %v1390_v57, %v1223_v24  ;;  %v1393_v32 = vpop.f32.mrf.mxu0 }
 0x205   : > { %v3847_v19 = vpop.f32.mrf.mxu1 }
 0x206   : > { %v5369_v16 = vadd.f32 %v3881_v63, %v3847_v19  ;;  %v3884_v17 = vpop.f32.mrf.mxu0 }
 0x207   : > { %v1226_v8 = vpop.f32.mrf.mxu1  ;;  %4087 = vmatmul.mubr.msk.bf16.gmra.mxu0 %vm1040_vm8, %v5117_v4 }
 0x208   : > { %v5373_v22 = vadd.f32 %v1393_v32, %v1226_v8  ;;  %v1406_v54 = vpop.f32.mrf.mxu0 }
 0x209   : > { %v3850_v47 = vpop.f32.mrf.mxu1  ;;  %4053 = vmatmul.mubr.msk.bf16.gmra.mxu1 %vm1040_vm8, %v5121_v60 }
 0x20a   : > { %v5377_v36 = vadd.f32 %v3884_v17, %v3850_v47  ;;  %4092 = vmatprep.mubr.msk.bf16.mxu1 %vm1040_vm8, %v6349_v55  ;;  %v3885_v50 = vpop.f32.mrf.mxu0 }
 0x20b   : > { %v1239_v45 = vpop.f32.mrf.mxu1 }
 0x20c   : > { %v5381_v11 = vadd.f32 %v1406_v54, %v1239_v45  ;;  %v1409_v62 = vpop.f32.mrf.mxu0 }
 0x20d   : > { %v3851_v28 = vpop.f32.mrf.mxu1 }
 0x20e   : > { %v5383_v42 = vadd.f32 %v3885_v50, %v3851_v28 }
 0x20f   : > { %v1242_v61 = vpop.f32.mrf.mxu1  ;;  %v3924_v20 = vpop.f32.mrf.mxu0 }
 0x210   : > { %v5385_v33 = vadd.f32 %v1409_v62, %v1242_v61 }
 0x211   : > { %v3890_v51 = vpop.f32.mrf.mxu1  ;;  %4093 = vmatmul.mubr.msk.bf16.vlgmr.msra.gmra.mxu1 %vm1040_vm8, %v4998_v59  ;;  %v1702_v57 = vpop.f32.mrf.mxu0 }
 0x212   : > { %v1587_v24 = vadd.f32 %v3890_v51, %v5265_v12  ;;  %4096 = vmatprep.mubr.msk.bf16.mxu1 %vm1040_vm8, %v4993_v27 }
 0x213   : > { %v1458_v55 = vpop.f32.mrf.mxu1  ;;  %v3925_v63 = vpop.f32.mrf.mxu0 }
 0x214   : > { %v1585_v19 = vadd.f32 %v1458_v55, %v5271_v52  ;;  %v5393_v32 = vadd.f32 %v3924_v20, %v1587_v24 }
 0x215   : > { %v3891_v8 = vpop.f32.mrf.mxu1  ;;  %v1705_v17 = vpop.f32.mrf.mxu0 }
 0x216   : > { %v1588_v47 = vadd.f32 %v3891_v8, %v5273_v35  ;;  %v5396_v54 = vadd.f32 %v1702_v57, %v1585_v19 }
 0x217   : > { %v1461_v45 = vpop.f32.mrf.mxu1  ;;  %v3928_v59 = vpop.f32.mrf.mxu0 }
 0x218   : > { %v1586_v50 = vadd.f32 %v1461_v45, %v5275_v37  ;;  %v5399_v12 = vadd.f32 %v3925_v63, %v1588_v47 }
 0x219   : > { %v3894_v28 = vpop.f32.mrf.mxu1  ;;  %4097 = vmatmul.mubr.msk.bf16.gmra.mxu1 %vm1040_vm8, %v5032_v23  ;;  %v1718_v27 = vpop.f32.mrf.mxu0 }
 0x21a   : > { %v1591_v52 = vadd.f32 %v3894_v28, %v5283_v10  ;;  %4100 = vmatprep.mubr.msk.bf16.mxu1 %vm1040_vm8, %v5018_v7  ;;  %v5406_v62 = vadd.f32 %v1705_v17, %v1586_v50 }
 0x21b   : > { %v1474_v35 = vpop.f32.mrf.mxu1  ;;  %v3929_v61 = vpop.f32.mrf.mxu0 }
 0x21c   : > { %v1589_v20 = vadd.f32 %v1474_v35, %v5287_v31  ;;  %v5409_v51 = vadd.f32 %v3928_v59, %v1591_v52 }
 0x21d   : > { %v3895_v37 = vpop.f32.mrf.mxu1  ;;  %v1721_v57 = vpop.f32.mrf.mxu0 }
 0x21e   : > { %v1592_v24 = vadd.f32 %v3895_v37, %v5289_v30  ;;  %v5412_v55 = vadd.f32 %v1718_v27, %v1589_v20 }
 0x21f   : > { %v1477_v23 = vpop.f32.mrf.mxu1  ;;  %v3932_v63 = vpop.f32.mrf.mxu0 }
 0x220   : > { %v1590_v10 = vadd.f32 %v1477_v23, %v5293_v48  ;;  %v5415_v19 = vadd.f32 %v3929_v61, %v1592_v24 }
 0x221   : > { %v3898_v7 = vpop.f32.mrf.mxu1  ;;  %4101 = vmatmul.mubr.msk.bf16.gmra.mxu1 %vm1040_vm8, %v5046_v56  ;;  %v1734_v8 = vpop.f32.mrf.mxu0 }
 0x222   : > { %v1595_v31 = vadd.f32 %v3898_v7, %v5299_v34  ;;  %4104 = vmatprep.mubr.msk.bf16.mxu1 %vm1040_vm8, %v5038_v39  ;;  %v5422_v17 = vadd.f32 %v1721_v57, %v1590_v10 }
 0x223   : > { %v1490_v30 = vpop.f32.mrf.mxu1  ;;  %v3933_v47 = vpop.f32.mrf.mxu0 }
 0x224   : > { %v1593_v45 = vadd.f32 %v1490_v30, %v5303_v41  ;;  %v5425_v59 = vadd.f32 %v3932_v63, %v1595_v31 }
 0x225   : > { %v3899_v48 = vpop.f32.mrf.mxu1  ;;  %v1737_v50 = vpop.f32.mrf.mxu0 }
 0x226   : > { %v1596_v28 = vadd.f32 %v3899_v48, %v5305_v25  ;;  %v5428_v27 = vadd.f32 %v1734_v8, %v1593_v45 }
 0x227   : > { %v1493_v56 = vpop.f32.mrf.mxu1  ;;  %v3936_v52 = vpop.f32.mrf.mxu0 }
 0x228   : > { %v1594_v34 = vadd.f32 %v1493_v56, %v5309_v14  ;;  %v5431_v35 = vadd.f32 %v3933_v47, %v1596_v28 }
 0x229   : > { %v3902_v39 = vpop.f32.mrf.mxu1  ;;  %4105 = vmatmul.mubr.msk.bf16.gmra.mxu1 %vm1040_vm8, %v5084_v26  ;;  %v1750_v61 = vpop.f32.mrf.mxu0 }
 0x22a   : > { %v1599_v41 = vadd.f32 %v3902_v39, %v5315_v21  ;;  %4108 = vmatprep.mubr.msk.bf16.mxu1 %vm1040_vm8, %v5056_v0  ;;  %v5438_v20 = vadd.f32 %v1737_v50, %v1594_v34 }
 0x22b   : > { %v1506_v25 = vpop.f32.mrf.mxu1  ;;  %v3937_v37 = vpop.f32.mrf.mxu0 }
 0x22c   : > { %v1597_v57 = vadd.f32 %v1506_v25, %v5319_v13  ;;  %v5441_v24 = vadd.f32 %v3936_v52, %v1599_v41 }
 0x22d   : > { %v3903_v14 = vpop.f32.mrf.mxu1  ;;  %v1753_v23 = vpop.f32.mrf.mxu0 }
 0x22e   : > { %v1600_v63 = vadd.f32 %v3903_v14, %v5321_v44  ;;  %v5444_v10 = vadd.f32 %v1750_v61, %v1597_v57 }
 0x22f   : > { %v1509_v26 = vpop.f32.mrf.mxu1  ;;  %v3940_v7 = vpop.f32.mrf.mxu0 }
 0x230   : > { %v1598_v21 = vadd.f32 %v1509_v26, %v5325_v15  ;;  %v5447_v8 = vadd.f32 %v3937_v37, %v1600_v63 }
 0x231   : > { %v3906_v0 = vpop.f32.mrf.mxu1  ;;  %4109 = vmatmul.mubr.msk.bf16.gmra.mxu1 %vm1040_vm8, %v5099_v2  ;;  %v1766_v31 = vpop.f32.mrf.mxu0 }
 0x232   : > { %v1603_v13 = vadd.f32 %v3906_v0, %v5331_v9  ;;  %4112 = vmatprep.mubr.msk.bf16.mxu1 %vm1040_vm8, %v5074_v5  ;;  %v5454_v30 = vadd.f32 %v1753_v23, %v1598_v21 }
 0x233   : > { %v1522_v44 = vpop.f32.mrf.mxu1  ;;  %v3941_v47 = vpop.f32.mrf.mxu0 }
 0x234   : > { %v1601_v45 = vadd.f32 %v1522_v44, %v5335_v1  ;;  %v5457_v48 = vadd.f32 %v3940_v7, %v1603_v13 }
 0x235   : > { %v3907_v15 = vpop.f32.mrf.mxu1  ;;  %v1769_v50 = vpop.f32.mrf.mxu0 }
 0x236   : > { %v1604_v28 = vadd.f32 %v3907_v15, %v5337_v40  ;;  %v5460_v56 = vadd.f32 %v1766_v31, %v1601_v45 }
 0x237   : > { %v1525_v2 = vpop.f32.mrf.mxu1  ;;  %v3944_v52 = vpop.f32.mrf.mxu0 }
 0x238   : > { %v1602_v9 = vadd.f32 %v1525_v2, %v5341_v18  ;;  %v5463_v34 = vadd.f32 %v3941_v47, %v1604_v28 }
 0x239   : > { %v3910_v5 = vpop.f32.mrf.mxu1  ;;  %4113 = vmatmul.mubr.msk.bf16.gmra.mxu1 %vm1040_vm8, %v5113_v29  ;;  %v1782_v39 = vpop.f32.mrf.mxu0 }
 0x23a   : > { %v1607_v1 = vadd.f32 %v3910_v5, %v5347_v43  ;;  %4116 = vmatprep.mubr.msk.bf16.mxu1 %vm1040_vm8, %v5096_v58  ;;  %v5470_v61 = vadd.f32 %v1769_v50, %v1602_v9 }
 0x23b   : > { %v1538_v40 = vpop.f32.mrf.mxu1  ;;  %v3945_v41 = vpop.f32.mrf.mxu0 }
 0x23c   : > { %v1605_v25 = vadd.f32 %v1538_v40, %v5351_v6  ;;  %v5473_v37 = vadd.f32 %v3944_v52, %v1607_v1 }
 0x23d   : > { %v3911_v18 = vpop.f32.mrf.mxu1  ;;  %v1785_v57 = vpop.f32.mrf.mxu0 }
 0x23e   : > { %v1608_v14 = vadd.f32 %v3911_v18, %v5353_v3  ;;  %v5476_v23 = vadd.f32 %v1782_v39, %v1605_v25 }
 0x23f   : > { %v1541_v29 = vpop.f32.mrf.mxu1  ;;  %v3948_v63 = vpop.f32.mrf.mxu0 }
 0x240   : > { %v1606_v43 = vadd.f32 %v1541_v29, %v5357_v46  ;;  %v5479_v26 = vadd.f32 %v3945_v41, %v1608_v14 }
 0x241   : > { %v3914_v58 = vpop.f32.mrf.mxu1  ;;  %4117 = vmatmul.mubr.msk.bf16.gmra.mxu1 %vm1040_vm8, %v5121_v60  ;;  %v1798_v7 = vpop.f32.mrf.mxu0 }
 0x242   : > { %v1611_v6 = vadd.f32 %v3914_v58, %v5363_v49  ;;  %4120 = vmatprep.mubr.msk.bf16.mxu1 %vm1040_vm8, %v5117_v4  ;;  %v5486_v21 = vadd.f32 %v1785_v57, %v1606_v43 }
 0x243   : > { %v1554_v3 = vpop.f32.mrf.mxu1  ;;  %v3949_v0 = vpop.f32.mrf.mxu0 }
 0x244   : > { %v1609_v31 = vadd.f32 %v1554_v3, %v5367_v53  ;;  %v5489_v13 = vadd.f32 %v3948_v63, %v1611_v6 }
 0x245   : > { %v3915_v46 = vpop.f32.mrf.mxu1  ;;  %v1801_v44 = vpop.f32.mrf.mxu0 }
 0x246   : > { %v1612_v47 = vadd.f32 %v3915_v46, %v5369_v16  ;;  %v5492_v45 = vadd.f32 %v1798_v7, %v1609_v31 }
 0x247   : > { %v1557_v60 = vpop.f32.mrf.mxu1  ;;  %v3952_v15 = vpop.f32.mrf.mxu0 }
 0x248   : > { %v1610_v49 = vadd.f32 %v1557_v60, %v5373_v22  ;;  %v5495_v50 = vadd.f32 %v3949_v0, %v1612_v47 }
 0x249   : > { %v3918_v4 = vpop.f32.mrf.mxu1  ;;  %4121 = vmatmul.mubr.bf16.gmra.mxu1 %v6334_v38  ;;  %v1814_v28 = vpop.f32.mrf.mxu0 }
 0x24a   : > { %v1615_v53 = vadd.f32 %v3918_v4, %v5377_v36  ;;  %v5499_v2 = vadd.f32 %v1801_v44, %v1610_v49 }
 0x24b   : > { %v1570_v52 = vpop.f32.mrf.mxu1  ;;  %v3953_v9 = vpop.f32.mrf.mxu0 }
 0x24c   : > { %v1613_v16 = vadd.f32 %v1570_v52, %v5381_v11  ;;  %v5502_v5 = vadd.f32 %v3952_v15, %v1615_v53 }
 0x24d   : > { %v3919_v39 = vpop.f32.mrf.mxu1  ;;  %v1817_v1 = vpop.f32.mrf.mxu0 }
 0x24e   : > { %v1616_v22 = vadd.f32 %v3919_v39, %v5383_v42  ;;  %v5505_v40 = vadd.f32 %v1814_v28, %v1613_v16 }
 0x24f   : > { %v1573_v41 = vpop.f32.mrf.mxu1  ;;  %v5507_v25 = vpop.f32.mrf.mxu0 }
 0x250   : > { %v1614_v38 = vadd.f32 %v1573_v41, %v5385_v33  ;;  %v5510_v36 = vadd.f32 %v3953_v9, %v1616_v22 }
 0x251   : > { %v3958_v18 = vpop.f32.mrf.mxu1  ;;  %v5512_v57 = vpop.f32.mrf.mxu0 }
 0x252   : > { %v5515_v11 = vadd.f32 %v3958_v18, %v5393_v32  ;;  %v5517_v14 = vadd.f32 %v1817_v1, %v1614_v38 }
 0x253   : > { %v1901_v29 = vpop.f32.mrf.mxu1  ;;  %v5519_v63 = vpop.f32.mrf.mxu0 }
 0x254   : > { %v5522_v42 = vadd.f32 %v1901_v29, %v5396_v54 }
 0x255   : > { %v3959_v43 = vpop.f32.mrf.mxu1  ;;  %v5524_v58 = vpop.f32.mrf.mxu0 }
 0x256   : > { %v5527_v33 = vadd.f32 %v3959_v43, %v5399_v12 }
 0x257   : > { %v1904_v7 = vpop.f32.mrf.mxu1  ;;  %v5529_v6 = vpop.f32.mrf.mxu0 }
 0x258   : > { %v5532_v32 = vadd.f32 %v1904_v7, %v5406_v62 }
 0x259   : > { %v3962_v3 = vpop.f32.mrf.mxu1  ;;  %v5534_v0 = vpop.f32.mrf.mxu0 }
 0x25a   : > { %v5537_v31 = vadd.f32 %v3962_v3, %v5409_v51 }
 0x25b   : > { %v1917_v54 = vpop.f32.mrf.mxu1  ;;  %v5539_v46 = vpop.f32.mrf.mxu0 }
 0x25c   : > { %v5542_v44 = vadd.f32 %v1917_v54, %v5412_v55 }
 0x25d   : > { %v3963_v12 = vpop.f32.mrf.mxu1  ;;  %v5544_v47 = vpop.f32.mrf.mxu0 }
 0x25e   : > { %v5547_v60 = vadd.f32 %v3963_v12, %v5415_v19 }
 0x25f   : > { %v1920_v62 = vpop.f32.mrf.mxu1  ;;  %v5549_v15 = vpop.f32.mrf.mxu0 }
 0x260   : > { %v5552_v49 = vadd.f32 %v1920_v62, %v5422_v17 }
 0x261   : > { %v3966_v51 = vpop.f32.mrf.mxu1  ;;  %v5554_v4 = vpop.f32.mrf.mxu0 }
 0x262   : > { %v5557_v28 = vadd.f32 %v3966_v51, %v5425_v59 }
 0x263   : > { %v1933_v55 = vpop.f32.mrf.mxu1  ;;  %v5559_v53 = vpop.f32.mrf.mxu0 }
 0x264   : > { %v5562_v52 = vadd.f32 %v1933_v55, %v5428_v27 }
 0x265   : > { %v3967_v19 = vpop.f32.mrf.mxu1  ;;  %v5564_v9 = vpop.f32.mrf.mxu0 }
 0x266   : > { %v5567_v16 = vadd.f32 %v3967_v19, %v5431_v35 }
 0x267   : > { %v1936_v17 = vpop.f32.mrf.mxu1  ;;  %v5569_v39 = vpop.f32.mrf.mxu0 }
 0x268   : > { %v5572_v1 = vadd.f32 %v1936_v17, %v5438_v20 }
 0x269   : > { %v3970_v59 = vpop.f32.mrf.mxu1  ;;  %v5574_v22 = vpop.f32.mrf.mxu0 }
 0x26a   : > { %v5577_v41 = vadd.f32 %v3970_v59, %v5441_v24 }
 0x26b   : > { %v1949_v27 = vpop.f32.mrf.mxu1  ;;  %v5579_v38 = vpop.f32.mrf.mxu0 }
 0x26c   : > { %v5582_v18 = vadd.f32 %v1949_v27, %v5444_v10 }
 0x26d   : > { %v3971_v35 = vpop.f32.mrf.mxu1  ;;  %v5584_v29 = vpop.f32.mrf.mxu0 }
 0x26e   : > { %v5587_v43 = vadd.f32 %v3971_v35, %v5447_v8 }
 0x26f   : > { %v1952_v20 = vpop.f32.mrf.mxu1  ;;  %v5589_v7 = vpop.f32.mrf.mxu0 }
 0x270   : > { %v5592_v3 = vadd.f32 %v1952_v20, %v5454_v30 }
 0x271   : > { %v3974_v24 = vpop.f32.mrf.mxu1  ;;  %v5594_v54 = vpop.f32.mrf.mxu0 }
 0x272   : > { %v5597_v12 = vadd.f32 %v3974_v24, %v5457_v48 }
 0x273   : > { %v1965_v10 = vpop.f32.mrf.mxu1  ;;  %v5599_v62 = vpop.f32.mrf.mxu0 }
 0x274   : > { %v5602_v51 = vadd.f32 %v1965_v10, %v5460_v56 }
 0x275   : > { %v3975_v8 = vpop.f32.mrf.mxu1  ;;  %v5604_v55 = vpop.f32.mrf.mxu0 }
 0x276   : > { %v5607_v19 = vadd.f32 %v3975_v8, %v5463_v34 }
 0x277   : > { %v1968_v30 = vpop.f32.mrf.mxu1  ;;  %v5609_v17 = vpop.f32.mrf.mxu0 }
 0x278   : > { %v5612_v59 = vadd.f32 %v1968_v30, %v5470_v61 }
 0x279   : > { %v3978_v48 = vpop.f32.mrf.mxu1  ;;  %v5614_v27 = vpop.f32.mrf.mxu0 }
 0x27a   : > { %6350 = vst [vmem:[#allocation6_spill] sm:$0xff] %v5614_v27  ;;  %v5617_v35 = vadd.f32 %v3978_v48, %v5473_v37 }
 0x27b   : > { %v1981_v56 = vpop.f32.mrf.mxu1  ;;  %v5619_v20 = vpop.f32.mrf.mxu0 }
 0x27c   : > { %6351 = vst [vmem:[#allocation7_spill] sm:$0xff] %v5619_v20  ;;  %v5622_v24 = vadd.f32 %v1981_v56, %v5476_v23 }
 0x27d   : > { %v3979_v34 = vpop.f32.mrf.mxu1  ;;  %v5624_v10 = vpop.f32.mrf.mxu0 }
 0x27e   : > { %6352 = vst [vmem:[#allocation4_spill] sm:$0xff] %v5624_v10  ;;  %v5627_v8 = vadd.f32 %v3979_v34, %v5479_v26 }
 0x27f   : > { %v1984_v61 = vpop.f32.mrf.mxu1  ;;  %v5629_v30 = vpop.f32.mrf.mxu0 }
 0x280   : > { %6353 = vst [vmem:[#allocation9_spill] sm:$0xff] %v5629_v30  ;;  %v5632_v27 = vadd.f32 %v1984_v61, %v5486_v21 }
 0x281   : > { %v3982_v37 = vpop.f32.mrf.mxu1  ;;  %v5634_v48 = vpop.f32.mrf.mxu0 }
 0x282   : > { %6354 = vst [vmem:[#allocation10_spill] sm:$0xff] %v5634_v48  ;;  %v5637_v20 = vadd.f32 %v3982_v37, %v5489_v13 }
 0x283   : > { %v1997_v23 = vpop.f32.mrf.mxu1  ;;  %v5639_v56 = vpop.f32.mrf.mxu0 }
 0x284   : > { %6355 = vst [vmem:[#allocation5_spill] sm:$0xff] %v5639_v56  ;;  %v5642_v10 = vadd.f32 %v1997_v23, %v5492_v45 }
 0x285   : > { %v3983_v26 = vpop.f32.mrf.mxu1  ;;  %v5644_v34 = vpop.f32.mrf.mxu0 }
 0x286   : > { %6356 = vst [vmem:[#allocation14_spill] sm:$0xff] %v5644_v34  ;;  %v5647_v30 = vadd.f32 %v3983_v26, %v5495_v50 }
 0x287   : > { %v2000_v21 = vpop.f32.mrf.mxu1  ;;  %v5649_v61 = vpop.f32.mrf.mxu0 }
 0x288   : > { %6357 = vst [vmem:[#allocation8_spill] sm:$0xff] %v5647_v30  ;;  %6358 = vst [vmem:[#allocation12_spill] sm:$0xff] %v5649_v61  ;;  %v5652_v48 = vadd.f32 %v2000_v21, %v5499_v2 }
 0x289   : > { %v3986_v13 = vpop.f32.mrf.mxu1  ;;  %v5654_v37 = vpop.f32.mrf.mxu0 }
 0x28a   : > { %6359 = vst [vmem:[#allocation15_spill] sm:$0xff] %v5652_v48  ;;  %6360 = vst [vmem:[#allocation11_spill] sm:$0xff] %v5654_v37  ;;  %v5657_v56 = vadd.f32 %v3986_v13, %v5502_v5 }
 0x28b   : > { %v2013_v45 = vpop.f32.mrf.mxu1  ;;  %v5659_v23 = vpop.f32.mrf.mxu0 }
 0x28c   : > { %6361 = vst [vmem:[#allocation13_spill] sm:$0xff] %v5657_v56  ;;  %6362 = vst [vmem:[#allocation3_spill] sm:$0xff] %v5659_v23  ;;  %v5662_v34 = vadd.f32 %v2013_v45, %v5505_v40 }
 0x28d   : > { %v3987_v50 = vpop.f32.mrf.mxu1  ;;  %v5664_v26 = vpop.f32.mrf.mxu0 }
 0x28e   : > { %6363 = vst [vmem:[#allocation16_spill] sm:$0xff] %v5662_v34  ;;  %6364 = vst [vmem:[#allocation17_spill] sm:$0xff] %v5664_v26  ;;  %v5667_v61 = vadd.f32 %v3987_v50, %v5510_v36 }
 0x28f   : > { %v2016_v2 = vpop.f32.mrf.mxu1  ;;  %v5672_v37 = vpop.f32.mrf.mxu0 }
 0x290   : > { %6365 = vst [vmem:[#allocation18_spill] sm:$0xff] %v5667_v61  ;;  %v5670_v21 = vadd.f32 %v2016_v2, %v5517_v14 }
 0x291   : > { %v5674_v5 = vpop.f32.mrf.mxu1  ;;  %v5678_v23 = vpop.f32.mrf.mxu0 }
 0x292   : > { %6366 = vst [vmem:[#allocation19_spill] sm:$0xff] %v5670_v21 }
 0x293   : > { %v5676_v13 = vpop.f32.mrf.mxu1  ;;  %v5684_v26 = vpop.f32.mrf.mxu0 }
 0x294   : > { %6367 = vst [vmem:[#allocation20_spill] sm:$0xff] %v5684_v26 }
 0x295   : > { %v5680_v40 = vpop.f32.mrf.mxu1  ;;  %v5690_v14 = vpop.f32.mrf.mxu0 }
 0x296   : > { %6370 = vst [vmem:[#allocation23_spill] sm:$0xff] %v5690_v14 }
 0x297   : > { %v5682_v45 = vpop.f32.mrf.mxu1  ;;  %v5696_v61 = vpop.f32.mrf.mxu0 }
 0x298   : > { %6373 = vst [vmem:[#allocation26_spill] sm:$0xff] %v5696_v61 }
 0x299   : > { %v5686_v36 = vpop.f32.mrf.mxu1  ;;  %v5702_v48 = vpop.f32.mrf.mxu0 }
 0x29a   : > { %6368 = vst [vmem:[#allocation21_spill] sm:$0xff] %v5686_v36  ;;  %6376 = vst [vmem:[#allocation29_spill] sm:$0xff] %v5702_v48 }
 0x29b   : > { %v5688_v50 = vpop.f32.mrf.mxu1  ;;  %v5708_v36 = vpop.f32.mrf.mxu0 }
 0x29c   : > { %6369 = vst [vmem:[#allocation22_spill] sm:$0xff] %v5688_v50  ;;  %6379 = vst [vmem:[#allocation32_spill] sm:$0xff] %v5708_v36 }
 0x29d   : > { %v5692_v2 = vpop.f32.mrf.mxu1 }
 0x29e   : > { %6371 = vst [vmem:[#allocation24_spill] sm:$0xff] %v5692_v2  ;;  %v5714_v2 = vpop.f32.mrf.mxu0 }
 0x29f   : > { %v5694_v21 = vpop.f32.mrf.mxu1  ;;  %6382 = vst [vmem:[#allocation35_spill] sm:$0xff] %v5714_v2 }
 0x2a0   : > { %6372 = vst [vmem:[#allocation25_spill] sm:$0xff] %v5694_v21 }
 0x2a1   : > { %v5698_v34 = vpop.f32.mrf.mxu1 }
 0x2a2   : > { %6374 = vst [vmem:[#allocation27_spill] sm:$0xff] %v5698_v34  ;;  %v5720_v34 = vpop.f32.mrf.mxu0 }
 0x2a3   : > { %v5700_v56 = vpop.f32.mrf.mxu1  ;;  %6385 = vst [vmem:[#allocation38_spill] sm:$0xff] %v5720_v34 }
 0x2a4   : > { %6375 = vst [vmem:[#allocation28_spill] sm:$0xff] %v5700_v56 }
 0x2a5   : > { %v5704_v30 = vpop.f32.mrf.mxu1 }
 0x2a6   : > { %6377 = vst [vmem:[#allocation30_spill] sm:$0xff] %v5704_v30  ;;  %v5726_v30 = vpop.f32.mrf.mxu0 }
 0x2a7   : > { %v5706_v26 = vpop.f32.mrf.mxu1  ;;  %6388 = vst [vmem:[#allocation41_spill] sm:$0xff] %v5726_v30 }
 0x2a8   : > { %6378 = vst [vmem:[#allocation31_spill] sm:$0xff] %v5706_v26 }
 0x2a9   : > { %v5710_v50 = vpop.f32.mrf.mxu1 }
 0x2aa   : > { %6380 = vst [vmem:[#allocation33_spill] sm:$0xff] %v5710_v50  ;;  %v5732_v50 = vpop.f32.mrf.mxu0 }
 0x2ab   : > { %v5712_v14 = vpop.f32.mrf.mxu1  ;;  %6391 = vst [vmem:[#allocation44_spill] sm:$0xff] %v5732_v50 }
 0x2ac   : > { %6381 = vst [vmem:[#allocation34_spill] sm:$0xff] %v5712_v14 }
 0x2ad   : > { %v5716_v21 = vpop.f32.mrf.mxu1 }
 0x2ae   : > { %6383 = vst [vmem:[#allocation36_spill] sm:$0xff] %v5716_v21  ;;  %v5738_v21 = vpop.f32.mrf.mxu0 }
 0x2af   : > { %v5718_v61 = vpop.f32.mrf.mxu1 }
 0x2b0   : > { %6384 = vst [vmem:[#allocation37_spill] sm:$0xff] %v5718_v61 }
 0x2b1   : > { %v5722_v56 = vpop.f32.mrf.mxu1 }
 0x2b2   : > { %6386 = vst [vmem:[#allocation39_spill] sm:$0xff] %v5722_v56  ;;  %v5744_v56 = vpop.f32.mrf.mxu0 }
 0x2b3   : > { %v5724_v48 = vpop.f32.mrf.mxu1 }
 0x2b4   : > { %6387 = vst [vmem:[#allocation40_spill] sm:$0xff] %v5724_v48 }
 0x2b5   : > { %v5728_v26 = vpop.f32.mrf.mxu1 }
 0x2b6   : > { %6389 = vst [vmem:[#allocation42_spill] sm:$0xff] %v5728_v26  ;;  %v5750_v26 = vpop.f32.mrf.mxu0 }
 0x2b7   : > { %v5730_v36 = vpop.f32.mrf.mxu1  ;;  %6398 = vst [vmem:[#allocation51_spill] sm:$0xff] %v5750_v26 }
 0x2b8   : > { %6390 = vst [vmem:[#allocation43_spill] sm:$0xff] %v5730_v36  ;;  %v5752_v36 = vld [vmem:[#allocation2] sm:$0xff]  }
 0x2b9   : > { %v5734_v14 = vpop.f32.mrf.mxu1 }
 0x2ba   : > { %6392 = vst [vmem:[#allocation45_spill] sm:$0xff] %v5734_v14  ;;  %v5769_v14 = vadd.f32 %v5524_v58, %v5532_v32  ;;  %v5793_v58 = vpop.f32.mrf.mxu0 }
 0x2bb   : > { %v5736_v2 = vpop.f32.mrf.mxu1 }
 0x2bc   : > { %6393 = vst [vmem:[#allocation46_spill] sm:$0xff] %v5736_v2  ;;  %v5773_v2 = vadd.f32 %v5529_v6, %v5537_v31  ;;  %v5796_v6 = vld [vmem:[#allocation2 + $0x18] sm:$0xff]   ;;  %v5805_v31 = vadd.f32 %v5559_v53, %v5567_v16  ;;  %v5831_v16 = vadd.f32 %v5579_v38, %v5587_v43  ;;  %v5848_v38 = vadd.f32 %v5589_v7, %v5597_v12 }
 0x2bd   : > { %v5740_v61 = vpop.f32.mrf.mxu1  ;;  %v5853_v43 = vadd.f32 %v5594_v54, %v5602_v51  ;;  %v5870_v54 = vadd.f32 %v5604_v55, %v5612_v59  ;;  %v5887_v59 = vld [vmem:[#allocation2 + $0x40] sm:$0xff]   ;;  %v6407_v55 = vld [vmem:[#allocation9_spill] sm:$0xff] }
 0x2be   : > { %6394 = vst [vmem:[#allocation47_spill] sm:$0xff] %v5740_v61  ;;  %v2226_v61 = vadd.f32 %v5507_v25, %v5515_v11  ;;  %v5777_v25 = vadd.f32 %v5534_v0, %v5542_v44  ;;  %v5801_v0 = vadd.f32 %v5554_v4, %v5562_v52  ;;  %v5809_v44 = vld [vmem:[#allocation2 + $0x10] sm:$0xff]   ;;  %v5827_v52 = vadd.f32 %v5574_v22, %v5582_v18 }
 0x2bf   : > { %v5742_v34 = vpop.f32.mrf.mxu1  ;;  %v5844_v22 = vadd.f32 %v5584_v29, %v5592_v3  ;;  %v5864_v3 = vld [vmem:[#allocation2 + $0x30] sm:$0xff]   ;;  %v6403_v29 = vld [vmem:[#allocation6_spill] sm:$0xff] }
 0x2c0   : > { %6395 = vst [vmem:[#allocation48_spill] sm:$0xff] %v5742_v34  ;;  %v2224_v34 = vadd.f32 %v5512_v57, %v5522_v42  ;;  %v5781_v57 = vadd.f32 %v5539_v46, %v5547_v60  ;;  %v5791_v42 = vadd.f32 %v5549_v15, %v5557_v28  ;;  %v5815_v15 = vadd.f32 %v5564_v9, %v5572_v1  ;;  %v5822_v28 = vld [vmem:[#allocation2 + $0x28] sm:$0xff]   ;;  %v5835_v1 = vld [vmem:[#allocation2 + $0x20] sm:$0xff]   ;;  %v5840_v60 = vpop.f32.mrf.mxu0 }
 0x2c1   : > { %v5746_v48 = vpop.f32.mrf.mxu1  ;;  %v2470_v4 = vadd.f32 %v5674_v5, %v2226_v61  ;;  %v5861_v5 = vld [vmem:[#allocation2 + $0x38] sm:$0xff]   ;;  %v5880_v18 = vadd.f32 %v6403_v29, %v5622_v24  ;;  %v6411_v29 = vld [vmem:[#allocation5_spill] sm:$0xff] }
 0x2c2   : > { %6396 = vst [vmem:[#allocation49_spill] sm:$0xff] %v5746_v48  ;;  %v2227_v48 = vadd.f32 %v5519_v63, %v5527_v33  ;;  %v5787_v63 = vadd.f32 %v5544_v47, %v5552_v49  ;;  %v5819_v49 = vadd.f32 %v5569_v39, %v5577_v41  ;;  %v5857_v41 = vadd.f32 %v5599_v62, %v5607_v19  ;;  %v5891_v51 = vpop.f32.mrf.mxu0  ;;  %v6406_v39 = vld [vmem:[#allocation4_spill] sm:$0xff]  ;;  %v6412_v33 = vld [vmem:[#allocation15_spill] sm:$0xff] }
 0x2c3   : > { %v5748_v30 = vpop.f32.mrf.mxu1  ;;  %v2468_v12 = vadd.f32 %v5676_v13, %v2224_v34  ;;  %v5876_v19 = vadd.f32 %v5609_v17, %v5617_v35  ;;  %v5884_v34 = vld [vmem:[#allocation2 + $0x48] sm:$0xff]   ;;  %v6405_v17 = vld [vmem:[#allocation7_spill] sm:$0xff]  ;;  %v2669_v24 = vadd.f32 %v5672_v37, %v2470_v4  ;;  %v5901_v53 = vadd.f32 %v6406_v39, %v5632_v27  ;;  %v5915_v37 = vld [vmem:[#allocation2 + $0x58] sm:$0xff]  }
 0x2c4   : > { %6397 = vst [vmem:[#allocation50_spill] sm:$0xff] %v5748_v30  ;;  %v5764_v30 = vld [vmem:[#allocation2 + $0x8] sm:$0xff]   ;;  %v2471_v62 = vadd.f32 %v5680_v40, %v2227_v48  ;;  %v5895_v35 = vadd.f32 %v6405_v17, %v5627_v8  ;;  %v5905_v47 = vadd.f32 %v6407_v55, %v5637_v20  ;;  %v5912_v48 = vld [vmem:[%s293_s15] ss:$0 sm:$0xff]  ;;  %6408 = vst [vmem:[#allocation7_spill] sm:$0xff] %v5915_v37 }
 0x2c5   : > { %v5756_v50 = vpop.f32.mrf.mxu1  ;;  %v2469_v27 = vadd.f32 %v5682_v45, %v5769_v14  ;;  %v6409_v4 = vld [vmem:[#allocation10_spill] sm:$0xff]  ;;  %v2667_v55 = vadd.f32 %v5678_v23, %v2468_v12  ;;  %v6410_v17 = vld [vmem:[#allocation8_spill] sm:$0xff]  ;;  %v5937_v14 = vpop.f32.mrf.mxu0  ;;  %v6422_v45 = vld [vmem:[#allocation11_spill] sm:$0xff] }
 0x2c6   : > { %v5922_v20 = vadd.f32 %v6409_v4, %v5642_v10  ;;  %v5927_v32 = vadd.f32 %v6411_v29, %v6410_v17  ;;  %v6413_v8 = vld [vmem:[#allocation14_spill] sm:$0xff]  ;;  %v6418_v4 = vld [vmem:[#allocation13_spill] sm:$0xff]  ;;  %v6419_v17 = vld [vmem:[#allocation12_spill] sm:$0xff] }
 0x2c7   : > { %v5783_v11 = vpop.f32.mrf.mxu1  ;;  %v5931_v26 = vadd.f32 %v6413_v8, %v6412_v33  ;;  %v6417_v33 = vld [vmem:[#allocation21_spill] sm:$0xff]  ;;  %v5952_v37 = vld [vmem:[#allocation2 + $0x68] sm:$0xff]  }
 0x2c8   : > { %6399 = vst [vmem:[#allocation52_spill] sm:$0xff] %v5783_v11  ;;  %v2474_v8 = vadd.f32 %v6417_v33, %v5773_v2  ;;  %6424 = vst [vmem:[#allocation5_spill] sm:$0xff] %v5952_v37  ;;  %v6426_v2 = vld [vmem:[#allocation22_spill] sm:$0xff]  ;;  %v5968_v11 = vpop.f32.mrf.mxu0  ;;  %v6441_v37 = vunpack.c.l.bf16 %v5752_v36 }
 0x2c9   : > { %v5807_v46 = vpop.f32.mrf.mxu1  ;;  %6414 = vst [vmem:[#allocation4_spill] sm:$0xff] %v5931_v26  ;;  %v2472_v33 = vadd.f32 %v6426_v2, %v5777_v25  ;;  %v6432_v25 = vld [vmem:[#allocation25_spill] sm:$0xff] }
 0x2ca   : > { %6400 = vst [vmem:[#allocation53_spill] sm:$0xff] %v5807_v46  ;;  %v6434_v2 = vld [vmem:[#allocation17_spill] sm:$0xff] }
 0x2cb   : > { %v5833_v9 = vpop.f32.mrf.mxu1 }
 0x2cc   : > { %6401 = vst [vmem:[#allocation54_spill] sm:$0xff] %v5833_v9  ;;  %v6421_v9 = vld [vmem:[#allocation16_spill] sm:$0xff] }
 0x2cd   : > { %v5859_v61 = vpop.f32.mrf.mxu1  ;;  %v5950_v46 = vadd.f32 %v6422_v45, %v6421_v9  ;;  %v6429_v9 = vld [vmem:[#allocation3_spill] sm:$0xff] }
 0x2ce   : > { %6402 = vst [vmem:[#allocation55_spill] sm:$0xff] %v5859_v61  ;;  %v5946_v61 = vadd.f32 %v6419_v17, %v6418_v4  ;;  %v6427_v4 = vld [vmem:[#allocation24_spill] sm:$0xff] }
 0x2cf   : > { %v5882_v7 = vpop.f32.mrf.mxu1  ;;  %6423 = vst [vmem:[#allocation8_spill] sm:$0xff] %v5950_v46  ;;  %v2475_v17 = vadd.f32 %v6427_v4, %v5781_v57  ;;  %v6433_v57 = vld [vmem:[#allocation19_spill] sm:$0xff] }
 0x2d0   : > { %6404 = vst [vmem:[#allocation6_spill] sm:$0xff] %v5882_v7  ;;  %v5933_v7 = vld [vmem:[#allocation2 + $0x50] sm:$0xff]   ;;  %6420 = vst [vmem:[#allocation10_spill] sm:$0xff] %v5946_v61  ;;  %v6428_v61 = vld [vmem:[#allocation18_spill] sm:$0xff]  ;;  %v5975_v4 = vadd.f32 %v6434_v2, %v6433_v57 }
 0x2d1   : > { %v4094_v13 = vpop.f32.mrf.mxu1  ;;  %6415 = vst [vmem:[#allocation9_spill] sm:$0xff] %v5933_v7  ;;  %v5963_v45 = vadd.f32 %v6429_v9, %v6428_v61  ;;  %v5965_v7 = vld [vmem:[#allocation2 + $0x60] sm:$0xff]   ;;  %v6436_v61 = vld [vmem:[#allocation26_spill] sm:$0xff] }
 0x2d2   : > { %v2865_v39 = vadd.f32 %v4094_v13, %v2669_v24  ;;  %v6416_v13 = vld [vmem:[#allocation20_spill] sm:$0xff]  ;;  %6431 = vst [vmem:[#allocation14_spill] sm:$0xff] %v5965_v7  ;;  %v2673_v9 = vadd.f32 %v6436_v61, %v2474_v8  ;;  %v5986_v61 = vpop.f32.mrf.mxu0 }
 0x2d3   : > { %v2736_v40 = vpop.f32.mrf.mxu1  ;;  %v2670_v24 = vadd.f32 %v6416_v13, %v2471_v62  ;;  %v6425_v13 = vld [vmem:[#allocation23_spill] sm:$0xff]  ;;  %6430 = vst [vmem:[#allocation15_spill] sm:$0xff] %v5963_v45  ;;  %6435 = vst [vmem:[#allocation20_spill] sm:$0xff] %v5975_v4  ;;  %v6440_v4 = vld [vmem:[#allocation32_spill] sm:$0xff] }
 0x2d4   : > { %v2904_v23 = vadd.f32 %v5912_v48, %v2865_v39  ;;  %v2863_v12 = vadd.f32 %v2736_v40, %v2667_v55  ;;  %v2668_v29 = vadd.f32 %v6425_v13, %v2469_v27  ;;  %v2473_v13 = vadd.f32 %v6432_v25, %v5787_v63  ;;  %v6439_v25 = vld [vmem:[#allocation29_spill] sm:$0xff] }
 0x2d5   : > { %v4095_v10 = vpop.f32.mrf.mxu1  ;;  %v6437_v40 = vunpack.c.l.bf16 %v5764_v30  ;;  %v2671_v57 = vadd.f32 %v6439_v25, %v2472_v33  ;;  %v2674_v8 = vadd.f32 %v6440_v4, %v2475_v17  ;;  %v6443_v33 = vld [vmem:[#allocation35_spill] sm:$0xff]  ;;  %v6444_v17 = vunpack.c.h.bf16 %v5764_v30 }
 0x2d6   : > { %v2936_v39 = vmul.f32 0.1, %v2904_v23  ;;  %v2902_v62 = vadd.f32 %v5912_v48, %v2863_v12  ;;  %v2866_v55 = vadd.f32 %v4095_v10, %v2670_v24 }
 0x2d7   : > { %v2739_v46 = vpop.f32.mrf.mxu1 }
 0x2d8   : > { %v2968_v10 = vmax.f32 %v2904_v23, %v2936_v39  ;;  %v2934_v12 = vmul.f32 0.1, %v2902_v62  ;;  %v2905_v27 = vadd.f32 %v5912_v48, %v2866_v55  ;;  %v2864_v24 = vadd.f32 %v2739_v46, %v2668_v29  ;;  %v6438_v46 = vld [vmem:[#allocation27_spill] sm:$0xff] }
 0x2d9   : > { %v4098_v45 = vpop.f32.mrf.mxu1  ;;  %v2478_v29 = vadd.f32 %v6438_v46, %v5791_v42 }
 0x2da   : > { %v3032_v7 = vadd.f32 %v6437_v40, %v2968_v10  ;;  %v2966_v23 = vmax.f32 %v2902_v62, %v2934_v12  ;;  %v2937_v39 = vmul.f32 0.1, %v2905_v27  ;;  %v2903_v55 = vadd.f32 %v5912_v48, %v2864_v24  ;;  %v6442_v12 = vld [vmem:[#allocation28_spill] sm:$0xff] }
 0x2db   : > { %v2869_v63 = vadd.f32 %v4098_v45, %v2673_v9  ;;  %v2752_v2 = vpop.f32.mrf.mxu1  ;;  %v2476_v24 = vadd.f32 %v6442_v12, %v5801_v0  ;;  %v2672_v9 = vadd.f32 %v6443_v33, %v2473_v13 }
 0x2dc   : > { %v3584_v26 = vpack.c.bf16 %v3032_v7, %v3032_v7  ;;  %v3030_v40 = vadd.f32 %v6441_v37, %v2966_v23  ;;  %v2969_v62 = vmax.f32 %v2905_v27, %v2937_v39  ;;  %v2935_v10 = vmul.f32 0.1, %v2903_v55  ;;  %v6445_v23 = vld [vmem:[#allocation30_spill] sm:$0xff] }
 0x2dd   : > { %v2908_v42 = vadd.f32 %v5912_v48, %v2869_v63  ;;  %v2867_v46 = vadd.f32 %v2752_v2, %v2671_v57  ;;  %v4099_v45 = vpop.f32.mrf.mxu1  ;;  %v2479_v0 = vadd.f32 %v6445_v23, %v5805_v31  ;;  %v6446_v57 = vld [vmem:[#allocation38_spill] sm:$0xff]  ;;  %v6003_v2 = vpop.f32.mrf.mxu0  ;;  %v6452_v23 = vld [vmem:[#allocation44_spill] sm:$0xff] }
 0x2de   : > { %3193 = vst.msk [vmem:[#allocation2 + $0x8] sm:$0xf] %vm3190_vm9, %v3584_v26  ;;  %3225 = vst.msk [vmem:[%s4354_s19 + $0x8] sm:$0xf] %vm3190_vm9, %v3584_v26  ;;  %v3582_v7 = vpack.c.bf16 %v3030_v40, %v3030_v40  ;;  %v3033_v37 = vadd.f32 %v6444_v17, %v2969_v62  ;;  %v2967_v27 = vmax.f32 %v2903_v55, %v2935_v10  ;;  %v6447_v26 = vunpack.c.h.bf16 %v5752_v36  ;;  %v6448_v40 = vld [vmem:[#allocation31_spill] sm:$0xff] }
 0x2df   : > { %v2870_v4 = vadd.f32 %v4099_v45, %v2674_v8  ;;  %v2940_v39 = vmul.f32 0.1, %v2908_v42  ;;  %v2906_v63 = vadd.f32 %v5912_v48, %v2867_v46  ;;  %v2755_v25 = vpop.f32.mrf.mxu1  ;;  %v2677_v13 = vadd.f32 %v6446_v57, %v2478_v29  ;;  %v6449_v46 = vld [vmem:[#allocation41_spill] sm:$0xff] }
 0x2e0   : > { %3191 = vst.msk [vmem:[#allocation2] sm:$0xf] %vm3190_vm9, %v3582_v7  ;;  %3223 = vst.msk [vmem:[%s4354_s19] sm:$0xf] %vm3190_vm9, %v3582_v7  ;;  %v3585_v30 = vpack.c.bf16 %v3033_v37, %v3033_v37  ;;  %v3031_v55 = vadd.f32 %v6447_v26, %v2967_v27  ;;  %v2868_v31 = vadd.f32 %v2755_v25, %v2672_v9  ;;  %v6450_v9 = vld [vmem:[#allocation33_spill] sm:$0xff] }
 0x2e1   : > { %v2909_v8 = vadd.f32 %v5912_v48, %v2870_v4  ;;  %v2477_v62 = vadd.f32 %v6448_v40, %v5815_v15  ;;  %v2972_v10 = vmax.f32 %v2908_v42, %v2940_v39  ;;  %v2938_v12 = vmul.f32 0.1, %v2906_v63  ;;  %v4102_v29 = vpop.f32.mrf.mxu1 }
 0x2e2   : > { %v2675_v45 = vadd.f32 %v6449_v46, %v2476_v24  ;;  %3194 = vst.msk [vmem:[#allocation2 + $0xc] sm:$0xf] %vm3190_vm9, %v3585_v30  ;;  %3226 = vst.msk [vmem:[%s4354_s19 + $0xc] sm:$0xf] %vm3190_vm9, %v3585_v30  ;;  %v3583_v33 = vpack.c.bf16 %v3031_v55, %v3031_v55  ;;  %v2907_v36 = vadd.f32 %v5912_v48, %v2868_v31  ;;  %v6451_v15 = vunpack.c.l.bf16 %v5796_v6  ;;  %v6023_v24 = vpop.f32.mrf.mxu0 }
 0x2e3   : > { %v2941_v7 = vmul.f32 0.1, %v2909_v8  ;;  %v2873_v17 = vadd.f32 %v4102_v29, %v2677_v13  ;;  %v2482_v37 = vadd.f32 %v6450_v9, %v5819_v49  ;;  %v2970_v27 = vmax.f32 %v2906_v63, %v2938_v12  ;;  %v2768_v4 = vpop.f32.mrf.mxu1  ;;  %v6453_v49 = vld [vmem:[#allocation34_spill] sm:$0xff] }
 0x2e4   : > { %v3036_v42 = vadd.f32 %v6451_v15, %v2972_v10  ;;  %v2678_v39 = vadd.f32 %v6452_v23, %v2479_v0  ;;  %3192 = vst.msk [vmem:[#allocation2 + $0x4] sm:$0xf] %vm3190_vm9, %v3583_v33  ;;  %3224 = vst.msk [vmem:[%s4354_s19 + $0x4] sm:$0xf] %vm3190_vm9, %v3583_v33  ;;  %v2939_v57 = vmul.f32 0.1, %v2907_v36  ;;  %v2871_v30 = vadd.f32 %v2768_v4, %v2675_v45 }
 0x2e5   : > { %v2973_v25 = vmax.f32 %v2909_v8, %v2941_v7  ;;  %v2912_v13 = vadd.f32 %v5912_v48, %v2873_v17  ;;  %v2480_v26 = vadd.f32 %v6453_v49, %v5827_v52  ;;  %v6454_v63 = vunpack.c.l.bf16 %v5809_v44  ;;  %v4103_v0 = vpop.f32.mrf.mxu1  ;;  %v6456_v45 = vld [vmem:[#allocation36_spill] sm:$0xff] }
 0x2e6   : > { %v3588_v55 = vpack.c.bf16 %v3036_v42, %v3036_v42  ;;  %v2676_v40 = vadd.f32 %v5738_v21, %v2477_v62  ;;  %v6455_v10 = vunpack.c.h.bf16 %v5796_v6  ;;  %v2971_v29 = vmax.f32 %v2907_v36, %v2939_v57  ;;  %v6043_v6 = vpop.f32.mrf.mxu0 }
 0x2e7   : > { %v3034_v31 = vadd.f32 %v6454_v63, %v2970_v27  ;;  %v2944_v46 = vmul.f32 0.1, %v2912_v13  ;;  %v2910_v8 = vadd.f32 %v5912_v48, %v2871_v30  ;;  %v2483_v33 = vadd.f32 %v6456_v45, %v5831_v16  ;;  %v2771_v17 = vpop.f32.mrf.mxu1  ;;  %v6458_v16 = vld [vmem:[#allocation37_spill] sm:$0xff]  ;;  %v6461_v30 = vld [vmem:[#allocation39_spill] sm:$0xff] }
 0x2e8   : > { %v3037_v12 = vadd.f32 %v6455_v10, %v2973_v25  ;;  %3197 = vst.msk [vmem:[#allocation2 + $0x18] sm:$0xf] %vm3190_vm9, %v3588_v55  ;;  %3229 = vst.msk [vmem:[%s4354_s19 + $0x18] sm:$0xf] %vm3190_vm9, %v3588_v55  ;;  %v2874_v7 = vadd.f32 %v4103_v0, %v2678_v39  ;;  %v2681_v21 = vadd.f32 %v5744_v56, %v2482_v37  ;;  %v6457_v36 = vunpack.c.h.bf16 %v5809_v44  ;;  %v6459_v37 = vld [vmem:[#allocation51_spill] sm:$0xff]  ;;  %v6063_v0 = vpop.f32.mrf.mxu0 }
 0x2e9   : > { %v3586_v52 = vpack.c.bf16 %v3034_v31, %v3034_v31  ;;  %v2976_v15 = vmax.f32 %v2912_v13, %v2944_v46  ;;  %v2942_v42 = vmul.f32 0.1, %v2910_v8  ;;  %v2481_v27 = vadd.f32 %v6458_v16, %v5844_v22  ;;  %v4106_v56 = vpop.f32.mrf.mxu1  ;;  %v6463_v46 = vld [vmem:[#allocation40_spill] sm:$0xff] }
 0x2ea   : > { %v3589_v62 = vpack.c.bf16 %v3037_v12, %v3037_v12  ;;  %v3035_v9 = vadd.f32 %v6457_v36, %v2971_v29  ;;  %v2913_v4 = vadd.f32 %v5912_v48, %v2874_v7  ;;  %v2872_v23 = vadd.f32 %v2771_v17, %v2676_v40  ;;  %v6464_v36 = vld [vmem:[#allocation42_spill] sm:$0xff] }
 0x2eb   : > { %3195 = vst.msk [vmem:[#allocation2 + $0x10] sm:$0xf] %vm3190_vm9, %v3586_v52  ;;  %3227 = vst.msk [vmem:[%s4354_s19 + $0x10] sm:$0xf] %vm3190_vm9, %v3586_v52  ;;  %v2679_v39 = vadd.f32 %v6459_v37, %v2480_v26  ;;  %v6460_v25 = vunpack.c.l.bf16 %v5822_v28  ;;  %v2974_v22 = vmax.f32 %v2910_v8, %v2942_v42  ;;  %v2877_v13 = vadd.f32 %v4106_v56, %v2681_v21  ;;  %v2784_v31 = vpop.f32.mrf.mxu1 }
 0x2ec   : > { %3198 = vst.msk [vmem:[#allocation2 + $0x1c] sm:$0xf] %vm3190_vm9, %v3589_v62  ;;  %3230 = vst.msk [vmem:[%s4354_s19 + $0x1c] sm:$0xf] %vm3190_vm9, %v3589_v62  ;;  %v3587_v44 = vpack.c.bf16 %v3035_v9, %v3035_v9  ;;  %v2486_v49 = vadd.f32 %v6461_v30, %v5848_v38  ;;  %v2945_v55 = vmul.f32 0.1, %v2913_v4  ;;  %v2911_v63 = vadd.f32 %v5912_v48, %v2872_v23 }
 0x2ed   : > { %v3040_v57 = vadd.f32 %v6460_v25, %v2976_v15  ;;  %v2682_v26 = vadd.f32 %v5793_v58, %v2483_v33  ;;  %v6462_v10 = vunpack.c.l.bf16 %v5835_v1  ;;  %v2916_v29 = vadd.f32 %v5912_v48, %v2877_v13  ;;  %v4107_v58 = vpop.f32.mrf.mxu1 }
 0x2ee   : > { %3196 = vst.msk [vmem:[#allocation2 + $0x14] sm:$0xf] %vm3190_vm9, %v3587_v44  ;;  %3228 = vst.msk [vmem:[%s4354_s19 + $0x14] sm:$0xf] %vm3190_vm9, %v3587_v44  ;;  %v2875_v38 = vadd.f32 %v2784_v31, %v2679_v39  ;;  %v2484_v8 = vadd.f32 %v6463_v46, %v5853_v43  ;;  %v2977_v45 = vmax.f32 %v2913_v4, %v2945_v55  ;;  %v2943_v52 = vmul.f32 0.1, %v2911_v63 }
 0x2ef   : > { %v3592_v40 = vpack.c.bf16 %v3040_v57, %v3040_v57  ;;  %v3038_v12 = vadd.f32 %v6462_v10, %v2974_v22  ;;  %v2680_v33 = vadd.f32 %v5840_v60, %v2481_v27  ;;  %v2948_v17 = vmul.f32 0.1, %v2916_v29  ;;  %v2787_v16 = vpop.f32.mrf.mxu1  ;;  %v6083_v60 = vpop.f32.mrf.mxu0 }
 0x2f0   : > { %v2914_v21 = vadd.f32 %v5912_v48, %v2875_v38  ;;  %v2878_v62 = vadd.f32 %v4107_v58, %v2682_v26  ;;  %v2487_v9 = vadd.f32 %v6464_v36, %v5857_v41  ;;  %v6465_v43 = vunpack.c.h.bf16 %v5822_v28  ;;  %v6466_v41 = vld [vmem:[#allocation43_spill] sm:$0xff] }
 0x2f1   : > { %3201 = vst.msk [vmem:[#allocation2 + $0x28] sm:$0xf] %vm3190_vm9, %v3592_v40  ;;  %3233 = vst.msk [vmem:[%s4354_s19 + $0x28] sm:$0xf] %vm3190_vm9, %v3592_v40  ;;  %v3590_v7 = vpack.c.bf16 %v3038_v12, %v3038_v12  ;;  %v2975_v42 = vmax.f32 %v2911_v63, %v2943_v52  ;;  %v2685_v4 = vadd.f32 %v5891_v51, %v2486_v49  ;;  %v6467_v44 = vunpack.c.h.bf16 %v5835_v1  ;;  %v4110_v51 = vpop.f32.mrf.mxu1  ;;  %v6469_v63 = vld [vmem:[#allocation45_spill] sm:$0xff]  ;;  %v6103_v40 = vpop.f32.mrf.mxu0 }
 0x2f2   : > { %v3041_v15 = vadd.f32 %v6465_v43, %v2977_v45  ;;  %v2980_v27 = vmax.f32 %v2916_v29, %v2948_v17  ;;  %v2946_v23 = vmul.f32 0.1, %v2914_v21  ;;  %v2917_v56 = vadd.f32 %v5912_v48, %v2878_v62  ;;  %v6473_v62 = vld [vmem:[#allocation47_spill] sm:$0xff] }
 0x2f3   : > { %3199 = vst.msk [vmem:[#allocation2 + $0x20] sm:$0xf] %vm3190_vm9, %v3590_v7  ;;  %3231 = vst.msk [vmem:[%s4354_s19 + $0x20] sm:$0xf] %vm3190_vm9, %v3590_v7  ;;  %v2876_v37 = vadd.f32 %v2787_v16, %v2680_v33  ;;  %v2485_v28 = vadd.f32 %v6466_v41, %v5870_v54  ;;  %v3039_v25 = vadd.f32 %v6467_v44, %v2975_v42  ;;  %v6468_v22 = vunpack.c.l.bf16 %v5861_v5  ;;  %v2800_v26 = vpop.f32.mrf.mxu1  ;;  %v6123_v42 = vpop.f32.mrf.mxu0 }
 0x2f4   : > { %v3593_v39 = vpack.c.bf16 %v3041_v15, %v3041_v15  ;;  %v2683_v57 = vadd.f32 %v5937_v14, %v2484_v8  ;;  %v2978_v30 = vmax.f32 %v2914_v21, %v2946_v23  ;;  %v2949_v49 = vmul.f32 0.1, %v2917_v56  ;;  %v6475_v23 = vld [vmem:[#allocation48_spill] sm:$0xff] }
 0x2f5   : > { %v3044_v13 = vadd.f32 %v6468_v22, %v2980_v27  ;;  %v2915_v55 = vadd.f32 %v5912_v48, %v2876_v37  ;;  %v2490_v31 = vadd.f32 %v6469_v63, %v5876_v19  ;;  %v3591_v1 = vpack.c.bf16 %v3039_v25, %v3039_v25  ;;  %v6471_v19 = vld [vmem:[#allocation46_spill] sm:$0xff] }
 0x2f6   : > { %3202 = vst.msk [vmem:[#allocation2 + $0x2c] sm:$0xf] %vm3190_vm9, %v3593_v39  ;;  %3234 = vst.msk [vmem:[%s4354_s19 + $0x2c] sm:$0xf] %vm3190_vm9, %v3593_v39  ;;  %v2881_v54 = vadd.f32 %v4110_v51, %v2685_v4  ;;  %v2686_v14 = vadd.f32 %v5968_v11, %v2487_v9  ;;  %v6470_v12 = vunpack.c.l.bf16 %v5864_v3  ;;  %v2981_v38 = vmax.f32 %v2917_v56, %v2949_v49  ;;  %v4111_v11 = vpop.f32.mrf.mxu1  ;;  %v6476_v51 = vld [vmem:[#allocation49_spill] sm:$0xff] }
 0x2f7   : > { %v3596_v10 = vpack.c.bf16 %v3044_v13, %v3044_v13  ;;  %v2947_v46 = vmul.f32 0.1, %v2915_v55  ;;  %v2488_v8 = vadd.f32 %v6471_v19, %v5880_v18  ;;  %3200 = vst.msk [vmem:[#allocation2 + $0x24] sm:$0xf] %vm3190_vm9, %v3591_v1  ;;  %3232 = vst.msk [vmem:[%s4354_s19 + $0x24] sm:$0xf] %vm3190_vm9, %v3591_v1  ;;  %v2879_v52 = vadd.f32 %v2800_v26, %v2683_v57 }
 0x2f8   : > { %v3042_v29 = vadd.f32 %v6470_v12, %v2978_v30  ;;  %v2920_v45 = vadd.f32 %v5912_v48, %v2881_v54  ;;  %v2684_v58 = vadd.f32 %v5986_v61, %v2485_v28  ;;  %v6472_v7 = vunpack.c.h.bf16 %v5861_v5  ;;  %v2803_v15 = vpop.f32.mrf.mxu1 }
 0x2f9   : > { %3205 = vst.msk [vmem:[#allocation2 + $0x38] sm:$0xf] %vm3190_vm9, %v3596_v10  ;;  %3237 = vst.msk [vmem:[%s4354_s19 + $0x38] sm:$0xf] %vm3190_vm9, %v3596_v10  ;;  %v2979_v18 = vmax.f32 %v2915_v55, %v2947_v46  ;;  %v2882_v21 = vadd.f32 %v4111_v11, %v2686_v14  ;;  %v2491_v36 = vadd.f32 %v6473_v62, %v5895_v35  ;;  %v6474_v16 = vunpack.c.h.bf16 %v5864_v3  ;;  %v6483_v62 = vld [vmem:[#allocation52_spill] sm:$0xff] }
 0x2fa   : > { %v3594_v33 = vpack.c.bf16 %v3042_v29, %v3042_v29  ;;  %v3045_v17 = vadd.f32 %v6472_v7, %v2981_v38  ;;  %v2952_v9 = vmul.f32 0.1, %v2920_v45  ;;  %v2918_v43 = vadd.f32 %v5912_v48, %v2879_v52 }
 0x2fb   : > { %v2689_v61 = vadd.f32 %v6003_v2, %v2490_v31  ;;  %v3043_v4 = vadd.f32 %v6474_v16, %v2979_v18  ;;  %v2921_v27 = vadd.f32 %v5912_v48, %v2882_v21  ;;  %v2880_v35 = vadd.f32 %v2803_v15, %v2684_v58  ;;  %v4114_v2 = vpop.f32.mrf.mxu1  ;;  %v6482_v21 = vld [vmem:[#allocation4_spill] sm:$0xff] }
 0x2fc   : > { %3203 = vst.msk [vmem:[#allocation2 + $0x30] sm:$0xf] %vm3190_vm9, %v3594_v33  ;;  %3235 = vst.msk [vmem:[%s4354_s19 + $0x30] sm:$0xf] %vm3190_vm9, %v3594_v33  ;;  %v3597_v5 = vpack.c.bf16 %v3045_v17, %v3045_v17  ;;  %v2489_v56 = vadd.f32 %v6475_v23, %v5901_v53  ;;  %v2984_v37 = vmax.f32 %v2920_v45, %v2952_v9  ;;  %v2950_v41 = vmul.f32 0.1, %v2918_v43 }
 0x2fd   : > { %v2687_v28 = vadd.f32 %v6023_v24, %v2488_v8  ;;  %v3595_v39 = vpack.c.bf16 %v3043_v4, %v3043_v4  ;;  %v2953_v44 = vmul.f32 0.1, %v2921_v27  ;;  %v2919_v3 = vadd.f32 %v5912_v48, %v2880_v35  ;;  %v2816_v30 = vpop.f32.mrf.mxu1  ;;  %v2639_v24 = vpop.f32.mrf.mxu0 }
 0x2fe   : > { %3206 = vst.msk [vmem:[#allocation2 + $0x3c] sm:$0xf] %vm3190_vm9, %v3597_v5  ;;  %3238 = vst.msk [vmem:[%s4354_s19 + $0x3c] sm:$0xf] %vm3190_vm9, %v3597_v5  ;;  %v2885_v25 = vadd.f32 %v4114_v2, %v2689_v61  ;;  %v2494_v57 = vadd.f32 %v6476_v51, %v5905_v47  ;;  %v6477_v53 = vunpack.c.l.bf16 %v5884_v34  ;;  %v2982_v13 = vmax.f32 %v2918_v43, %v2950_v41  ;;  %v6478_v47 = vld [vmem:[#allocation50_spill] sm:$0xff]  ;;  %v6484_v43 = vld [vmem:[#allocation7_spill] sm:$0xff] }
 0x2ff   : > { %v2690_v49 = vadd.f32 %v6043_v6, %v2491_v36  ;;  %3204 = vst.msk [vmem:[#allocation2 + $0x34] sm:$0xf] %vm3190_vm9, %v3595_v39  ;;  %3236 = vst.msk [vmem:[%s4354_s19 + $0x34] sm:$0xf] %vm3190_vm9, %v3595_v39  ;;  %v2985_v55 = vmax.f32 %v2921_v27, %v2953_v44  ;;  %v2951_v63 = vmul.f32 0.1, %v2919_v3  ;;  %v2883_v1 = vadd.f32 %v2816_v30, %v2687_v28  ;;  %v4115_v12 = vpop.f32.mrf.mxu1 }
 0x300   : > { %v3048_v22 = vadd.f32 %v6477_v53, %v2984_v37  ;;  %v2924_v31 = vadd.f32 %v5912_v48, %v2885_v25  ;;  %v2492_v54 = vadd.f32 %v6478_v47, %v5922_v20  ;;  %v6479_v14 = vunpack.c.l.bf16 %v5887_v59  ;;  %v6487_v2 = vld [vmem:[#allocation9_spill] sm:$0xff]  ;;  %v6489_v25 = vld [vmem:[#allocation10_spill] sm:$0xff] }
 0x301   : > { %v2688_v6 = vadd.f32 %v6063_v0, %v2489_v56  ;;  %v6480_v29 = vunpack.c.h.bf16 %v5884_v34  ;;  %v2983_v46 = vmax.f32 %v2919_v3, %v2951_v63  ;;  %v2922_v8 = vadd.f32 %v5912_v48, %v2883_v1  ;;  %v2819_v11 = vpop.f32.mrf.mxu1  ;;  %v4088_v34 = vpop.f32.mrf.mxu0  ;;  %v6486_v56 = vld [vmem:[#allocation14_spill] sm:$0xff]  ;;  %v6490_v51 = vld [vmem:[#allocation53_spill] sm:$0xff] }
 0x302   : > { %v3600_v26 = vpack.c.bf16 %v3048_v22, %v3048_v22  ;;  %v3046_v10 = vadd.f32 %v6479_v14, %v2982_v13  ;;  %v2956_v19 = vmul.f32 0.1, %v2924_v31  ;;  %v2495_v45 = vadd.f32 %v5756_v50, %v5927_v32  ;;  %v6492_v1 = vld [vmem:[#allocation54_spill] sm:$0xff] }
 0x303   : > { %v3049_v38 = vadd.f32 %v6480_v29, %v2985_v55  ;;  %v2886_v52 = vadd.f32 %v4115_v12, %v2690_v49  ;;  %v2693_v0 = vadd.f32 %v6083_v60, %v2494_v57  ;;  %v6481_v33 = vunpack.c.h.bf16 %v5887_v59  ;;  %v4118_v9 = vpop.f32.mrf.mxu1 }
 0x304   : > { %3209 = vst.msk [vmem:[#allocation2 + $0x48] sm:$0xf] %vm3190_vm9, %v3600_v26  ;;  %3241 = vst.msk [vmem:[%s4354_s19 + $0x48] sm:$0xf] %vm3190_vm9, %v3600_v26  ;;  %v3598_v20 = vpack.c.bf16 %v3046_v10, %v3046_v10  ;;  %v2988_v17 = vmax.f32 %v2924_v31, %v2956_v19  ;;  %v2954_v18 = vmul.f32 0.1, %v2922_v8  ;;  %v2493_v50 = vadd.f32 %v6483_v62, %v6482_v21 }
 0x305   : > { %v3601_v58 = vpack.c.bf16 %v3049_v38, %v3049_v38  ;;  %v3047_v7 = vadd.f32 %v6481_v33, %v2983_v46  ;;  %v2925_v32 = vadd.f32 %v5912_v48, %v2886_v52  ;;  %v2884_v36 = vadd.f32 %v2819_v11, %v2688_v6  ;;  %v2832_v35 = vpop.f32.mrf.mxu1  ;;  %v6491_v31 = vld [vmem:[#allocation8_spill] sm:$0xff]  ;;  %v6494_v26 = vld [vmem:[#allocation55_spill] sm:$0xff] }
 0x306   : > { %3207 = vst.msk [vmem:[#allocation2 + $0x40] sm:$0xf] %vm3190_vm9, %v3598_v20  ;;  %3239 = vst.msk [vmem:[%s4354_s19 + $0x40] sm:$0xf] %vm3190_vm9, %v3598_v20  ;;  %v2691_v60 = vadd.f32 %v6103_v40, %v2492_v54  ;;  %v6485_v15 = vunpack.c.l.bf16 %v6484_v43  ;;  %v2986_v5 = vmax.f32 %v2922_v8, %v2954_v18  ;;  %v2889_v16 = vadd.f32 %v4118_v9, %v2693_v0  ;;  %v2652_v40 = vpop.f32.mrf.mxu0  ;;  %v6493_v54 = vld [vmem:[#allocation15_spill] sm:$0xff]  ;;  %v6497_v20 = vld [vmem:[#allocation6_spill] sm:$0xff] }
 0x307   : > { %3210 = vst.msk [vmem:[#allocation2 + $0x4c] sm:$0xf] %vm3190_vm9, %v3601_v58  ;;  %3242 = vst.msk [vmem:[%s4354_s19 + $0x4c] sm:$0xf] %vm3190_vm9, %v3601_v58  ;;  %v3599_v59 = vpack.c.bf16 %v3047_v7, %v3047_v7  ;;  %v2957_v4 = vmul.f32 0.1, %v2925_v32  ;;  %v2923_v27 = vadd.f32 %v5912_v48, %v2884_v36  ;;  %v2694_v23 = vadd.f32 %v6123_v42, %v2495_v45  ;;  %v4119_v42 = vpop.f32.mrf.mxu1 }
 0x308   : > { %v3052_v61 = vadd.f32 %v6485_v15, %v2988_v17  ;;  %v3023_v37 = vunpack.c.h.bf16 %v6486_v56  ;;  %v6488_v28 = vunpack.c.l.bf16 %v6487_v2  ;;  %v2928_v44 = vadd.f32 %v5912_v48, %v2889_v16  ;;  %v4089_v29 = vpop.f32.mrf.mxu0  ;;  %v6496_v45 = vld [vmem:[#allocation20_spill] sm:$0xff]  ;;  %v6499_v17 = vld [vmem:[#allocation5_spill] sm:$0xff] }
 0x309   : > { %3208 = vst.msk [vmem:[#allocation2 + $0x44] sm:$0xf] %vm3190_vm9, %v3599_v59  ;;  %3240 = vst.msk [vmem:[%s4354_s19 + $0x44] sm:$0xf] %vm3190_vm9, %v3599_v59  ;;  %v2887_v3 = vadd.f32 %v2832_v35, %v2691_v60  ;;  %v2498_v57 = vadd.f32 %v6490_v51, %v6489_v25  ;;  %v2989_v53 = vmax.f32 %v2925_v32, %v2957_v4  ;;  %v2955_v22 = vmul.f32 0.1, %v2923_v27 }
 0x30a   : > { %v3604_v41 = vpack.c.bf16 %v3052_v61, %v3052_v61  ;;  %v3050_v39 = vadd.f32 %v6488_v28, %v2986_v5  ;;  %v2692_v13 = vadd.f32 %v2639_v24, %v2493_v50  ;;  %v2960_v49 = vmul.f32 0.1, %v2928_v44  ;;  %v2835_v24 = vpop.f32.mrf.mxu1  ;;  %v4222_v25 = vld [vmem:[#allocation2 + $0x78] sm:$0xff]  }
 0x30b   : > { %v2926_v55 = vadd.f32 %v5912_v48, %v2887_v3  ;;  %v2890_v63 = vadd.f32 %v4119_v42, %v2694_v23  ;;  %v2496_v47 = vadd.f32 %v6492_v1, %v6491_v31  ;;  %v2499_v14 = vadd.f32 %v6494_v26, %v6493_v54 }
 0x30c   : > { %3213 = vst.msk [vmem:[#allocation2 + $0x58] sm:$0xf] %vm3190_vm9, %v3604_v41  ;;  %3245 = vst.msk [vmem:[%s4354_s19 + $0x58] sm:$0xf] %vm3190_vm9, %v3604_v41  ;;  %v3602_v30 = vpack.c.bf16 %v3050_v39, %v3050_v39  ;;  %v6495_v10 = vunpack.c.h.bf16 %v6484_v43  ;;  %v2987_v6 = vmax.f32 %v2923_v27, %v2955_v22  ;;  %v2992_v38 = vmax.f32 %v2928_v44, %v2960_v49  ;;  %v4122_v7 = vpop.f32.mrf.mxu1 }
 0x30d   : > { %v2958_v46 = vmul.f32 0.1, %v2926_v55  ;;  %v2929_v19 = vadd.f32 %v5912_v48, %v2890_v63  ;;  %v2888_v8 = vadd.f32 %v2835_v24, %v2692_v13  ;;  %v2497_v52 = vadd.f32 %v6497_v20, %v6496_v45  ;;  %v4223_v63 = vld [vmem:[#allocation2 + $0x70] sm:$0xff]  }
 0x30e   : > { %v3053_v12 = vadd.f32 %v6495_v10, %v2989_v53  ;;  %3211 = vst.msk [vmem:[#allocation2 + $0x50] sm:$0xf] %vm3190_vm9, %v3602_v30  ;;  %3243 = vst.msk [vmem:[%s4354_s19 + $0x50] sm:$0xf] %vm3190_vm9, %v3602_v30  ;;  %v6498_v0 = vunpack.c.h.bf16 %v6487_v2  ;;  %v2697_v33 = vadd.f32 %v4088_v34, %v2498_v57  ;;  %v6500_v18 = vunpack.c.l.bf16 %v6499_v17  ;;  %v2848_v59 = vpop.f32.mrf.mxu1  ;;  %v2655_v34 = vpop.f32.mrf.mxu0 }
 0x30f   : > { %v2990_v62 = vmax.f32 %v2926_v55, %v2958_v46  ;;  %v2961_v50 = vmul.f32 0.1, %v2929_v19  ;;  %v2927_v32 = vadd.f32 %v5912_v48, %v2888_v8  ;;  %v2695_v60 = vadd.f32 %v2652_v40, %v2496_v47 }
 0x310   : > { %v3605_v11 = vpack.c.bf16 %v3053_v12, %v3053_v12  ;;  %v3051_v58 = vadd.f32 %v6498_v0, %v2987_v6  ;;  %v3056_v21 = vadd.f32 %v6500_v18, %v2992_v38  ;;  %v2893_v9 = vadd.f32 %v4122_v7, %v2697_v33  ;;  %v4123_v23 = vpop.f32.mrf.mxu1 }
 0x311   : > { %v2698_v43 = vadd.f32 %v4089_v29, %v2499_v14  ;;  %v6501_v61 = vunpack.c.l.bf16 %v6486_v56  ;;  %v2993_v16 = vmax.f32 %v2929_v19, %v2961_v50  ;;  %v2959_v4 = vmul.f32 0.1, %v2927_v32 }
 0x312   : > { %3214 = vst.msk [vmem:[#allocation2 + $0x5c] sm:$0xf] %vm3190_vm9, %v3605_v11  ;;  %3246 = vst.msk [vmem:[%s4354_s19 + $0x5c] sm:$0xf] %vm3190_vm9, %v3605_v11  ;;  %v3603_v36 = vpack.c.bf16 %v3051_v58, %v3051_v58  ;;  %v3608_v15 = vpack.c.bf16 %v3056_v21, %v3056_v21  ;;  %v2932_v27 = vadd.f32 %v5912_v48, %v2893_v9  ;;  %v6502_v2 = vunpack.c.h.bf16 %v6499_v17  ;;  %v2851_v53 = vpop.f32.mrf.mxu1 }
 0x313   : > { %v3054_v5 = vadd.f32 %v6501_v61, %v2990_v62  ;;  %v2891_v35 = vadd.f32 %v2848_v59, %v2695_v60  ;;  %v2696_v41 = vadd.f32 %v2655_v34, %v2497_v52  ;;  %v2991_v39 = vmax.f32 %v2927_v32, %v2959_v4 }
 0x314   : > { %3212 = vst.msk [vmem:[#allocation2 + $0x54] sm:$0xf] %vm3190_vm9, %v3603_v36  ;;  %3244 = vst.msk [vmem:[%s4354_s19 + $0x54] sm:$0xf] %vm3190_vm9, %v3603_v36  ;;  %v3057_v28 = vadd.f32 %v6502_v2, %v2993_v16  ;;  %v2894_v44 = vadd.f32 %v4123_v23, %v2698_v43  ;;  %v2964_v3 = vmul.f32 0.1, %v2932_v27  ;;  %v3028_v51 = vunpack.c.l.bf16 %v4222_v25 }
 0x315   : > { %3217 = vst.msk [vmem:[#allocation2 + $0x68] sm:$0xf] %vm3190_vm9, %v3608_v15  ;;  %3249 = vst.msk [vmem:[%s4354_s19 + $0x68] sm:$0xf] %vm3190_vm9, %v3608_v15  ;;  %v3606_v40 = vpack.c.bf16 %v3054_v5, %v3054_v5  ;;  %v2930_v57 = vadd.f32 %v5912_v48, %v2891_v35  ;;  %v3055_v42 = vadd.f32 %v3023_v37, %v2991_v39  ;;  %v3026_v31 = vunpack.c.l.bf16 %v4223_v63 }
 0x316   : > { %v3609_v22 = vpack.c.bf16 %v3057_v28, %v3057_v28  ;;  %v2933_v13 = vadd.f32 %v5912_v48, %v2894_v44  ;;  %v2892_v30 = vadd.f32 %v2851_v53, %v2696_v41  ;;  %v2996_v49 = vmax.f32 %v2932_v27, %v2964_v3 }
 0x317   : > { %3215 = vst.msk [vmem:[#allocation2 + $0x60] sm:$0xf] %vm3190_vm9, %v3606_v40  ;;  %3247 = vst.msk [vmem:[%s4354_s19 + $0x60] sm:$0xf] %vm3190_vm9, %v3606_v40  ;;  %v2962_v55 = vmul.f32 0.1, %v2930_v57  ;;  %v3607_v1 = vpack.c.bf16 %v3055_v42, %v3055_v42  ;;  %v3029_v54 = vunpack.c.h.bf16 %v4222_v25  ;;  %v3027_v12 = vunpack.c.h.bf16 %v4223_v63 }
 0x318   : > { %3218 = vst.msk [vmem:[#allocation2 + $0x6c] sm:$0xf] %vm3190_vm9, %v3609_v22  ;;  %3250 = vst.msk [vmem:[%s4354_s19 + $0x6c] sm:$0xf] %vm3190_vm9, %v3609_v22  ;;  %v2965_v47 = vmul.f32 0.1, %v2933_v13  ;;  %v2931_v26 = vadd.f32 %v5912_v48, %v2892_v30  ;;  %v3060_v56 = vadd.f32 %v3028_v51, %v2996_v49 }
 0x319   : > { %v2994_v37 = vmax.f32 %v2930_v57, %v2962_v55  ;;  %3216 = vst.msk [vmem:[#allocation2 + $0x64] sm:$0xf] %vm3190_vm9, %v3607_v1  ;;  %3248 = vst.msk [vmem:[%s4354_s19 + $0x64] sm:$0xf] %vm3190_vm9, %v3607_v1 }
 0x31a   : > { %v2997_v14 = vmax.f32 %v2933_v13, %v2965_v47  ;;  %v2963_v10 = vmul.f32 0.1, %v2931_v26  ;;  %v3612_v6 = vpack.c.bf16 %v3060_v56, %v3060_v56 }
 0x31b   : > { %v3058_v24 = vadd.f32 %v3026_v31, %v2994_v37 }
 0x31c   : > { %v3061_v29 = vadd.f32 %v3029_v54, %v2997_v14  ;;  %v2995_v38 = vmax.f32 %v2931_v26, %v2963_v10  ;;  %3221 = vst.msk [vmem:[#allocation2 + $0x78] sm:$0xf] %vm3190_vm9, %v3612_v6  ;;  %3253 = vst.msk [vmem:[%s4354_s19 + $0x78] sm:$0xf] %vm3190_vm9, %v3612_v6 }
 0x31d   : > { %v3610_v48 = vpack.c.bf16 %v3058_v24, %v3058_v24 }
 0x31e   : > { %v3613_v46 = vpack.c.bf16 %v3061_v29, %v3061_v29  ;;  %v3059_v19 = vadd.f32 %v3027_v12, %v2995_v38 }
 0x31f   : > { %3219 = vst.msk [vmem:[#allocation2 + $0x70] sm:$0xf] %vm3190_vm9, %v3610_v48  ;;  %3251 = vst.msk [vmem:[%s4354_s19 + $0x70] sm:$0xf] %vm3190_vm9, %v3610_v48 }
 0x320   : > { %3222 = vst.msk [vmem:[#allocation2 + $0x7c] sm:$0xf] %vm3190_vm9, %v3613_v46  ;;  %3254 = vst.msk [vmem:[%s4354_s19 + $0x7c] sm:$0xf] %vm3190_vm9, %v3613_v46  ;;  %v3611_v8 = vpack.c.bf16 %v3059_v19, %v3059_v19 }
 0x322   : > { %3220 = vst.msk [vmem:[#allocation2 + $0x74] sm:$0xf] %vm3190_vm9, %v3611_v8  ;;  %3252 = vst.msk [vmem:[%s4354_s19 + $0x74] sm:$0xf] %vm3190_vm9, %v3611_v8 }
 0x323 PF: > { %s15_s22 = sadd.s32 1, %s4262_s22   ;;  %s6503_s18 = smov %s4254_s20 }
 0x324   : > { %p12_p8 = scmp.ge.s32.totalorder %s15_s22, 6   ;;  %s6504_s19 = smov %s4258_s21 }
 0x325   : > { %s6505_s20 = smov %s6508_s23  ;;  %s6506_s21 = smov %s6512_s24 }
 0x326   :  { %14 = sbr.rel (!%p12_p8) target bundleno = 3 (0x3), region = 86 }

</bundles_post_ra>
